<compile_context>
chip_gen: v6e
topology: v6e:2x2x1
jax: 0.10.0
libtpu: 0.0.40
codegen_flags: <defaults>
</compile_context>

<pallas_src>
import jax
import jax.numpy as jnp
from jax.experimental import pallas as pl
from jax.experimental.pallas import tpu as pltpu


def _round_up(x, m):
    return ((x + m - 1) // m) * m


def fused_mlp_kernel(x_ref, w_ref, b_ref, o_ref):
    """o = tanh(x @ Wf + bf) on one (TB, 9) row block.

    x_ref : [TB, 9]  activation tile (batch on sublanes, features on lanes)
    w_ref : [9, 9]   collapsed weight (VMEM-resident)
    b_ref : [1, 9]   collapsed bias   (VMEM-resident)
    o_ref : [TB, 9]
    """
    y = jnp.dot(x_ref[...], w_ref[...], preferred_element_type=jnp.float32)
    o_ref[...] = jnp.tanh(y + b_ref[...])


def _collapse(params):
    w1, b1 = params["linear"]
    w3, b3 = params["linear3"]
    w2, b2 = params["linear2"]
    Wf = w1 @ w3 @ w2                   # [9, 9]
    bf = (b1 @ w3 + b3) @ w2 + b2       # [1, 9]
    return Wf, bf


def cnn_instead_estimator(state, params, *, block_b=8192, min_pallas_batch=512):
    """state: [B, 9]. Returns tanh(linear2(linear3(linear(state)))) as [B, 9] f32."""
    Wf, bf = _collapse(params)
    x = state.astype(jnp.float32)
    B = x.shape[0]

    # Small-batch fast path: pallas_call launch overhead dwarfs ~100 FLOP/row.
    if B < min_pallas_batch:
        return jnp.tanh(x @ Wf + bf)

    # Row-block tile: must be a multiple of 8 (sublane rule) or the full batch
    # dim; the feature dim (9) always equals the full array dim, so it's legal.
    block_b = _round_up(max(int(block_b), 8), 8)
    TB = min(block_b, B)                       # == B (full dim) or multiple of 8
    # v7x: keep >= 2 grid steps for large batches so both TensorCores stream.
    if B >= 4096 and pl.cdiv(B, TB) < 2:
        TB = _round_up(pl.cdiv(B, 2), 8)
    grid = pl.cdiv(B, TB)

    # No wrapper-side pad / transpose: stream (TB, 9) blocks of `state`
    # directly; the ragged tail is handled by the masked boundary block.
    return pl.pallas_call(
        fused_mlp_kernel,
        out_shape=jax.ShapeDtypeStruct((B, 9), jnp.float32),
        grid=(grid,),
        in_specs=[
            pl.BlockSpec((TB, 9), lambda i: (i, 0)),  # activations: streamed
            pl.BlockSpec((9, 9), lambda i: (0, 0)),   # collapsed weight: resident
            pl.BlockSpec((1, 9), lambda i: (0, 0)),   # collapsed bias: resident
        ],
        out_specs=pl.BlockSpec((TB, 9), lambda i: (i, 0)),
        compiler_params=pltpu.CompilerParams(
            dimension_semantics=("parallel",)),       # 2 TCs on v7x, no-op elsewhere
    )(x, Wf, bf)


def init_params(key, n_qubits):
    """Mimics PyTorch nn.Linear default init U(-1/sqrt(fan_in), +1/sqrt(fan_in))."""
    def linear_init(k, fan_in, fan_out):
        kw, kb = jax.random.split(k)
        bound = 1.0 / jnp.sqrt(fan_in)
        # stored as [in, out] so the math is x @ W + b
        W = jax.random.uniform(kw, (fan_in, fan_out), jnp.float32, -bound, bound)
        b = jax.random.uniform(kb, (1, fan_out), jnp.float32, -bound, bound)
        return W, b

    k1, k2, k3 = jax.random.split(key, 3)
    return {
        "linear": linear_init(k1, 9, n_qubits),          # nn.Linear(9, n_qubits)
        "linear3": linear_init(k2, n_qubits, n_qubits),  # nn.Linear(n_qubits, n_qubits)
        "linear2": linear_init(k3, n_qubits, 9),         # nn.Linear(n_qubits, 9)
    }


def reference(state, params):
    """Plain-JAX reference of the original (un-collapsed) forward pass."""
    w1, b1 = params["linear"]
    w3, b3 = params["linear3"]
    w2, b2 = params["linear2"]
    x = state.astype(jnp.float32)
    x = x @ w1 + b1
    x = x @ w3 + b3
    return jnp.tanh(x @ w2 + b2)


if __name__ == "__main__":
    key = jax.random.PRNGKey(0)
    k_params, k_s1, k_s2 = jax.random.split(key, 3)

    n_qubits = 8
    params = init_params(k_params, n_qubits)

    # Tolerance accounts for the (exact) algebraic collapse changing float
    # rounding order plus MXU f32 accumulation; real bugs are O(0.1+).
    ATOL = RTOL = 2e-3

    # Tiny batch (flattened 3x3 board -> 9 features): exercises the XLA fast path.
    s_small = jax.random.normal(k_s1, (2, 9), dtype=jnp.float32)
    out_small = jax.block_until_ready(cnn_instead_estimator(s_small, params))
    assert out_small.shape == (2, 9)
    assert jnp.allclose(out_small, reference(s_small, params), atol=ATOL, rtol=RTOL)

    # Larger ragged batch: exercises the Pallas path with a 2-step pipelined
    # grid and a masked boundary block (1666 is not a multiple of 1024 or 8).
    s_big = jax.random.normal(k_s2, (1666, 9), dtype=jnp.float32)
    out_big = jax.block_until_ready(
        cnn_instead_estimator(s_big, params, block_b=1024, min_pallas_batch=256))
    assert out_big.shape == (1666, 9)
    assert jnp.allclose(out_big, reference(s_big, params), atol=ATOL, rtol=RTOL)

    print("KERNEL_OK")
</pallas_src>

<mosaic_0001>
module attributes {stable_mosaic.version = 11 : i64} {
  func.func @fused_mlp_kernel(%arg0: i32, %arg1: memref<1024x9xf32, #tpu.memory_space<vmem>>, %arg2: memref<9x9xf32, #tpu.memory_space<vmem>>, %arg3: memref<1x9xf32, #tpu.memory_space<vmem>>, %arg4: memref<1024x9xf32, #tpu.memory_space<vmem>>) attributes {dimension_semantics = [#tpu.dimension_semantics<parallel>], iteration_bounds = array<i64: 2>, scalar_prefetch = 0 : i64, scratch_operands = 0 : i64, tpu.core_type = #tpu.core_type<tc>, window_params = [{transform_indices = @transform_0, window_bounds = array<i64: 1024, 9>}, {pipeline_mode = #tpu.pipeline_mode<synchronous>, transform_indices = @transform_1, window_bounds = array<i64: 9, 9>}, {pipeline_mode = #tpu.pipeline_mode<synchronous>, transform_indices = @transform_2, window_bounds = array<i64: 1, 9>}, {transform_indices = @transform_3, window_bounds = array<i64: 1024, 9>}]} {
    %c0 = arith.constant 0 : index
    %c0_0 = arith.constant 0 : index
    %0 = vector.load %arg1[%c0, %c0_0] : memref<1024x9xf32, #tpu.memory_space<vmem>>, vector<1024x9xf32>
    %c0_1 = arith.constant 0 : index
    %c0_2 = arith.constant 0 : index
    %1 = vector.load %arg2[%c0_1, %c0_2] : memref<9x9xf32, #tpu.memory_space<vmem>>, vector<9x9xf32>
    %cst = arith.constant dense<0.000000e+00> : vector<1024x9xf32>
    %2 = tpu.matmul %0, %1, %cst {dimension_numbers = #tpu.dot_dimension_numbers<[1], [0], [0], [1], [0, 0, 1, 1], [], []>} : vector<1024x9xf32>, vector<9x9xf32>, vector<1024x9xf32> -> vector<1024x9xf32>
    %c0_3 = arith.constant 0 : index
    %c0_4 = arith.constant 0 : index
    %3 = vector.load %arg3[%c0_3, %c0_4] : memref<1x9xf32, #tpu.memory_space<vmem>>, vector<1x9xf32>
    %4 = vector.broadcast %3 : vector<1x9xf32> to vector<1024x9xf32>
    %5 = arith.addf %2, %4 : vector<1024x9xf32>
    %6 = math.tanh %5 : vector<1024x9xf32>
    %c0_5 = arith.constant 0 : index
    %c0_6 = arith.constant 0 : index
    %7 = vector.load %arg4[%c0_5, %c0_6] : memref<1024x9xf32, #tpu.memory_space<vmem>>, vector<1024x9xf32>
    tpu.vector_store %arg4[%c0_5, %c0_6], %6 {strides = array<i32>} : memref<1024x9xf32, #tpu.memory_space<vmem>>, vector<1024x9xf32>,
    return
  }
  func.func @transform_0(%arg0: i32) -> (i32, i32) {
    %c0_i32 = arith.constant 0 : i32
    %c0_i32_0 = arith.constant 0 : i32
    return %arg0, %c0_i32 : i32, i32
  }
  func.func @transform_1(%arg0: i32) -> (i32, i32) {
    %c0_i32 = arith.constant 0 : i32
    %c0_i32_0 = arith.constant 0 : i32
    %c0_i32_1 = arith.constant 0 : i32
    return %c0_i32, %c0_i32_0 : i32, i32
  }
  func.func @transform_2(%arg0: i32) -> (i32, i32) {
    %c0_i32 = arith.constant 0 : i32
    %c0_i32_0 = arith.constant 0 : i32
    %c0_i32_1 = arith.constant 0 : i32
    return %c0_i32, %c0_i32_0 : i32, i32
  }
  func.func @transform_3(%arg0: i32) -> (i32, i32) {
    %c0_i32 = arith.constant 0 : i32
    %c0_i32_0 = arith.constant 0 : i32
    return %arg0, %c0_i32 : i32, i32
  }
}

</mosaic_0001>

<bundles_post_ra>
// kernel: tpu_custom_call.1
= control target key start
LH: loop header
LB: loop body
LE: loop exit
PB: predicated region body
PF: predicated region fallthrough
CT: control target
= control target key end

     0   :  { %s3087_s12 = smov 0   ;;  %s3089_s13 = smov 0   ;;  %s3991_s0 = inlined_call_operand.vmem [shape: f32[1666,9], index: 0, kind: input, shape index: {}]   ;;  %s3992_s1 = inlined_call_operand.vmem [shape: f32[9,9], index: 1, kind: input, shape index: {}]   ;;  %s3993_s2 = inlined_call_operand.vmem [shape: f32[1,9], index: 2, kind: input, shape index: {}]   ;;  %s3994_s3 = inlined_call_operand.vmem [shape: f32[1666,9], index: 3, kind: output, shape index: {}]  }
   0x1   :  { %s3091_s14 = smov 0  }
   0x2 LB: > { %s3100_s15 = sadd.s32 4294967295, %s3033_s14   ;;  %s3102_s16 = sadd.s32 1, %s3033_s14   ;;  %s3033_s14 = sphi %s3091_s14, %s4003_s14   ;;  %s3029_s13 = sphi %s3089_s13, %s4002_s13   ;;  %s3025_s12 = sphi %s3087_s12, %s4001_s12  }
   0x3   : > { %s85_s17 = ssub.s32 %s3033_s14, %s3102_s16  ;;  %s88_s18 = sadd.s32 1, %s3029_s13 }
   0x4   : > { %p86_p0 = scmp.eq.s32.totalorder %s85_s17, 0  ;;  %p98_p1 = scmp.ne.s32.totalorder %s3029_s13, %s3025_s12 }
   0x5   : > { %p99_p2 = scmp.eq.s32.totalorder %s3100_s15, 1  ;;  %p2150_p3 = scmp.ge.s32.totalorder %s3033_s14, 1 }
   0x6   : > { %s3110_s19 = scalar_select %p86_p0, %s3029_s13, %s88_s18  }
   0x7   : > { %p3112_p4 = por %p99_p2, %p98_p1  ;;  %p146_p5 = scmp.lt.s32.totalorder %s3033_s14, 3 }
   0x9   : > { %p147_p6 = pnand %p2150_p3, %p146_p5 }
   0xa   : > { %s3123_s25 = sshll.u32 (!%p147_p6), %s3100_s15, 7  ;;  %s170_s6 = sand.u32 (!%p147_p6), 1, %s3025_s12  }
   0xb   : > { %150 = sbr.rel (%p147_p6) target bundleno = 423 (0x1a7), region = 32  ;;  %p178_p7 = scmp.lt.s32.totalorder (!%p147_p6), %s3123_s25, 208 }
   0xc   : > { %s2151_s7 = sshll.u32 (!%p147_p6), %s170_s6, 10 }
   0xd   : > { %s3410_s8 = scalar_lea.vmem (!%p147_p6), [#allocation2], %s2151_s7  }
  0x10   : > { %v321_v0 = vld [vmem:[%s3992_s1 + $0x8] sm:$0x1]  ;;  %vm714_vm0 = vcmask 1040384   ;;  %v320_v1 = vld [vmem:[%s3992_s1] sm:$0xff]  ;;  %s179_s26 = scalar_select %p178_p7, %s3123_s25, 208  ;;  %vm329_vm1 = vcmask 72704  }
  0x11   : > { %2434 = vmatprep.subr.msk.mxu0 %vm714_vm0, %v321_v0  ;;  %2630 = vmatprep.subr.msk.mxu1 %vm714_vm0, %v321_v0  ;;  %s1687_s11 = ssub.s32 (%p3112_p4), 209, %s3123_s25  ;;  %s2301_s12 = sshll.u32 (%p3112_p4), %s3100_s15, 10 }
  0x12   : > { %2435 = vmatpush3.msk.msra.mxu0 %vm714_vm0, %v321_v0  ;;  %2632 = vmatpush3.msk.msra.mxu1 %vm714_vm0, %v321_v0  ;;  %s2153_s27 = sshll.u32 %s179_s26, 3  ;;  %p1688_p8 = scmp.lt.s32.totalorder (%p3112_p4), %s1687_s11, 128 }
  0x13   : > { %2436 = vmatprep.subr.mxu0 %v320_v1  ;;  %2631 = vmatprep.subr.mxu1 %v320_v1  ;;  %s3130_s30 = scalar_lea.vmem %s3991_s0, %s2153_s27  ;;  %s3792_s18 = scalar_lea.vmem (%p3112_p4), %s3994_s3, %s2301_s12  }
  0x14   : > { %2437 = vmatpush3.msra.mxu0 %v320_v1  ;;  %2633 = vmatpush3.msra.mxu1 %v320_v1  ;;  %v192_v2 = vld [vmem:[%s3130_s30] sm:$0xff]  ;;  %v193_v4 = vld [vmem:[%s3130_s30 + $0x8] sm:$0xff]  ;;  %v194_v6 = vld [vmem:[%s3130_s30 + $0x10] sm:$0xff] }
  0x15   : > { %v256_v3 = vld [vmem:[%s3130_s30 + $0x200] sm:$0xff]  ;;  %2438 = vmatprep.mubr.msk.f32.mxu0 %vm329_vm1, %v192_v2  ;;  %v257_v5 = vld [vmem:[%s3130_s30 + $0x208] sm:$0xff]  ;;  %v258_v7 = vld [vmem:[%s3130_s30 + $0x210] sm:$0xff] }
  0x16   : > { %2534 = vmatprep.mubr.msk.f32.mxu1 %vm329_vm1, %v256_v3  ;;  %2439 = vmatmul.mubr.msk.f32.vlgmr.msra.gmra.mxu0 %vm329_vm1, %v193_v4  ;;  %v195_v8 = vld [vmem:[%s3130_s30 + $0x18] sm:$0xff]  ;;  %v196_v10 = vld [vmem:[%s3130_s30 + $0x20] sm:$0xff]  ;;  %v197_v12 = vld [vmem:[%s3130_s30 + $0x28] sm:$0xff] }
  0x17   : > { %2535 = vmatmul.mubr.msk.f32.vlgmr.msra.gmra.mxu1 %vm329_vm1, %v257_v5  ;;  %2441 = vmatprep.mubr.msk.f32.mxu0 %vm329_vm1, %v194_v6  ;;  %v259_v9 = vld [vmem:[%s3130_s30 + $0x218] sm:$0xff]  ;;  %v260_v11 = vld [vmem:[%s3130_s30 + $0x220] sm:$0xff]  ;;  %v261_v13 = vld [vmem:[%s3130_s30 + $0x228] sm:$0xff] }
  0x18   : > { %2537 = vmatprep.mubr.msk.f32.mxu1 %vm329_vm1, %v258_v7  ;;  %v198_v14 = vld [vmem:[%s3130_s30 + $0x30] sm:$0xff]  ;;  %v199_v16 = vld [vmem:[%s3130_s30 + $0x38] sm:$0xff]  ;;  %v200_v18 = vld [vmem:[%s3130_s30 + $0x40] sm:$0xff] }
  0x19   : > { %v262_v15 = vld [vmem:[%s3130_s30 + $0x230] sm:$0xff]  ;;  %v263_v17 = vld [vmem:[%s3130_s30 + $0x238] sm:$0xff]  ;;  %v264_v19 = vld [vmem:[%s3130_s30 + $0x240] sm:$0xff] }
  0x1a   : > { %2442 = vmatmul.mubr.msk.f32.gmra.mxu0 %vm329_vm1, %v195_v8  ;;  %v201_v20 = vld [vmem:[%s3130_s30 + $0x48] sm:$0xff]  ;;  %v202_v22 = vld [vmem:[%s3130_s30 + $0x50] sm:$0xff]  ;;  %v203_v24 = vld [vmem:[%s3130_s30 + $0x58] sm:$0xff] }
  0x1b   : > { %2538 = vmatmul.mubr.msk.f32.gmra.mxu1 %vm329_vm1, %v259_v9  ;;  %2444 = vmatprep.mubr.msk.f32.mxu0 %vm329_vm1, %v196_v10  ;;  %v265_v21 = vld [vmem:[%s3130_s30 + $0x248] sm:$0xff]  ;;  %v266_v23 = vld [vmem:[%s3130_s30 + $0x250] sm:$0xff]  ;;  %v267_v25 = vld [vmem:[%s3130_s30 + $0x258] sm:$0xff] }
  0x1c   : > { %2540 = vmatprep.mubr.msk.f32.mxu1 %vm329_vm1, %v260_v11  ;;  %v204_v26 = vld [vmem:[%s3130_s30 + $0x60] sm:$0xff]  ;;  %v205_v28 = vld [vmem:[%s3130_s30 + $0x68] sm:$0xff]  ;;  %v206_v30 = vld [vmem:[%s3130_s30 + $0x70] sm:$0xff] }
  0x1d   : > { %v268_v27 = vld [vmem:[%s3130_s30 + $0x260] sm:$0xff]  ;;  %v269_v29 = vld [vmem:[%s3130_s30 + $0x268] sm:$0xff]  ;;  %v270_v31 = vld [vmem:[%s3130_s30 + $0x270] sm:$0xff] }
  0x1e   : > { %2445 = vmatmul.mubr.msk.f32.gmra.mxu0 %vm329_vm1, %v197_v12  ;;  %v207_v32 = vld [vmem:[%s3130_s30 + $0x78] sm:$0xff]  ;;  %v208_v34 = vld [vmem:[%s3130_s30 + $0x80] sm:$0xff]  ;;  %v209_v36 = vld [vmem:[%s3130_s30 + $0x88] sm:$0xff] }
  0x1f   : > { %2541 = vmatmul.mubr.msk.f32.gmra.mxu1 %vm329_vm1, %v261_v13  ;;  %2447 = vmatprep.mubr.msk.f32.mxu0 %vm329_vm1, %v198_v14  ;;  %v271_v33 = vld [vmem:[%s3130_s30 + $0x278] sm:$0xff]  ;;  %v272_v35 = vld [vmem:[%s3130_s30 + $0x280] sm:$0xff]  ;;  %v273_v37 = vld [vmem:[%s3130_s30 + $0x288] sm:$0xff] }
  0x20   : > { %2543 = vmatprep.mubr.msk.f32.mxu1 %vm329_vm1, %v262_v15  ;;  %v210_v38 = vld [vmem:[%s3130_s30 + $0x90] sm:$0xff]  ;;  %v211_v40 = vld [vmem:[%s3130_s30 + $0x98] sm:$0xff]  ;;  %v212_v42 = vld [vmem:[%s3130_s30 + $0xa0] sm:$0xff] }
  0x21   : > { %v274_v39 = vld [vmem:[%s3130_s30 + $0x290] sm:$0xff]  ;;  %v275_v41 = vld [vmem:[%s3130_s30 + $0x298] sm:$0xff]  ;;  %v276_v43 = vld [vmem:[%s3130_s30 + $0x2a0] sm:$0xff] }
  0x22   : > { %2448 = vmatmul.mubr.msk.f32.gmra.mxu0 %vm329_vm1, %v199_v16  ;;  %v213_v44 = vld [vmem:[%s3130_s30 + $0xa8] sm:$0xff]  ;;  %v214_v46 = vld [vmem:[%s3130_s30 + $0xb0] sm:$0xff]  ;;  %v215_v48 = vld [vmem:[%s3130_s30 + $0xb8] sm:$0xff] }
  0x23   : > { %2544 = vmatmul.mubr.msk.f32.gmra.mxu1 %vm329_vm1, %v263_v17  ;;  %2450 = vmatprep.mubr.msk.f32.mxu0 %vm329_vm1, %v200_v18  ;;  %v277_v45 = vld [vmem:[%s3130_s30 + $0x2a8] sm:$0xff]  ;;  %v278_v47 = vld [vmem:[%s3130_s30 + $0x2b0] sm:$0xff]  ;;  %v279_v49 = vld [vmem:[%s3130_s30 + $0x2b8] sm:$0xff] }
  0x24   : > { %2546 = vmatprep.mubr.msk.f32.mxu1 %vm329_vm1, %v264_v19  ;;  %v216_v50 = vld [vmem:[%s3130_s30 + $0xc0] sm:$0xff]  ;;  %v217_v52 = vld [vmem:[%s3130_s30 + $0xc8] sm:$0xff]  ;;  %v218_v54 = vld [vmem:[%s3130_s30 + $0xd0] sm:$0xff] }
  0x25   : > { %v280_v51 = vld [vmem:[%s3130_s30 + $0x2c0] sm:$0xff]  ;;  %v281_v53 = vld [vmem:[%s3130_s30 + $0x2c8] sm:$0xff]  ;;  %v282_v55 = vld [vmem:[%s3130_s30 + $0x2d0] sm:$0xff] }
  0x26   : > { %2451 = vmatmul.mubr.msk.f32.gmra.mxu0 %vm329_vm1, %v201_v20  ;;  %v219_v56 = vld [vmem:[%s3130_s30 + $0xd8] sm:$0xff]  ;;  %v220_v58 = vld [vmem:[%s3130_s30 + $0xe0] sm:$0xff]  ;;  %v221_v60 = vld [vmem:[%s3130_s30 + $0xe8] sm:$0xff] }
  0x27   : > { %2547 = vmatmul.mubr.msk.f32.gmra.mxu1 %vm329_vm1, %v265_v21  ;;  %2453 = vmatprep.mubr.msk.f32.mxu0 %vm329_vm1, %v202_v22  ;;  %v283_v57 = vld [vmem:[%s3130_s30 + $0x2d8] sm:$0xff]  ;;  %v284_v59 = vld [vmem:[%s3130_s30 + $0x2e0] sm:$0xff]  ;;  %v285_v61 = vld [vmem:[%s3130_s30 + $0x2e8] sm:$0xff] }
  0x28   : > { %2549 = vmatprep.mubr.msk.f32.mxu1 %vm329_vm1, %v266_v23  ;;  %v222_v62 = vld [vmem:[%s3130_s30 + $0xf0] sm:$0xff]  ;;  %v223_v0 = vld [vmem:[%s3130_s30 + $0xf8] sm:$0xff]  ;;  %v224_v2 = vld [vmem:[%s3130_s30 + $0x100] sm:$0xff] }
  0x29   : > { %v286_v63 = vld [vmem:[%s3130_s30 + $0x2f0] sm:$0xff]  ;;  %v287_v1 = vld [vmem:[%s3130_s30 + $0x2f8] sm:$0xff]  ;;  %v288_v3 = vld [vmem:[%s3130_s30 + $0x300] sm:$0xff] }
  0x2a   : > { %2454 = vmatmul.mubr.msk.f32.gmra.mxu0 %vm329_vm1, %v203_v24  ;;  %v225_v4 = vld [vmem:[%s3130_s30 + $0x108] sm:$0xff]  ;;  %v226_v6 = vld [vmem:[%s3130_s30 + $0x110] sm:$0xff]  ;;  %v227_v8 = vld [vmem:[%s3130_s30 + $0x118] sm:$0xff] }
  0x2b   : > { %2550 = vmatmul.mubr.msk.f32.gmra.mxu1 %vm329_vm1, %v267_v25  ;;  %2456 = vmatprep.mubr.msk.f32.mxu0 %vm329_vm1, %v204_v26  ;;  %v289_v5 = vld [vmem:[%s3130_s30 + $0x308] sm:$0xff]  ;;  %v290_v7 = vld [vmem:[%s3130_s30 + $0x310] sm:$0xff]  ;;  %v291_v9 = vld [vmem:[%s3130_s30 + $0x318] sm:$0xff] }
  0x2c   : > { %2552 = vmatprep.mubr.msk.f32.mxu1 %vm329_vm1, %v268_v27  ;;  %v228_v10 = vld [vmem:[%s3130_s30 + $0x120] sm:$0xff]  ;;  %v229_v12 = vld [vmem:[%s3130_s30 + $0x128] sm:$0xff]  ;;  %v230_v14 = vld [vmem:[%s3130_s30 + $0x130] sm:$0xff] }
  0x2d   : > { %v292_v11 = vld [vmem:[%s3130_s30 + $0x320] sm:$0xff]  ;;  %v293_v13 = vld [vmem:[%s3130_s30 + $0x328] sm:$0xff]  ;;  %v294_v15 = vld [vmem:[%s3130_s30 + $0x330] sm:$0xff] }
  0x2e   : > { %2457 = vmatmul.mubr.msk.f32.gmra.mxu0 %vm329_vm1, %v205_v28  ;;  %v231_v16 = vld [vmem:[%s3130_s30 + $0x138] sm:$0xff]  ;;  %v232_v18 = vld [vmem:[%s3130_s30 + $0x140] sm:$0xff]  ;;  %v233_v20 = vld [vmem:[%s3130_s30 + $0x148] sm:$0xff] }
  0x2f   : > { %2553 = vmatmul.mubr.msk.f32.gmra.mxu1 %vm329_vm1, %v269_v29  ;;  %2459 = vmatprep.mubr.msk.f32.mxu0 %vm329_vm1, %v206_v30  ;;  %v295_v17 = vld [vmem:[%s3130_s30 + $0x338] sm:$0xff]  ;;  %v296_v19 = vld [vmem:[%s3130_s30 + $0x340] sm:$0xff]  ;;  %v297_v21 = vld [vmem:[%s3130_s30 + $0x348] sm:$0xff] }
  0x30   : > { %2555 = vmatprep.mubr.msk.f32.mxu1 %vm329_vm1, %v270_v31  ;;  %v234_v22 = vld [vmem:[%s3130_s30 + $0x150] sm:$0xff]  ;;  %v235_v24 = vld [vmem:[%s3130_s30 + $0x158] sm:$0xff]  ;;  %v236_v26 = vld [vmem:[%s3130_s30 + $0x160] sm:$0xff] }
  0x31   : > { %v298_v23 = vld [vmem:[%s3130_s30 + $0x350] sm:$0xff]  ;;  %v299_v25 = vld [vmem:[%s3130_s30 + $0x358] sm:$0xff]  ;;  %v300_v27 = vld [vmem:[%s3130_s30 + $0x360] sm:$0xff] }
  0x32   : > { %2460 = vmatmul.mubr.msk.f32.gmra.mxu0 %vm329_vm1, %v207_v32  ;;  %v237_v28 = vld [vmem:[%s3130_s30 + $0x168] sm:$0xff]  ;;  %v238_v30 = vld [vmem:[%s3130_s30 + $0x170] sm:$0xff]  ;;  %v239_v32 = vld [vmem:[%s3130_s30 + $0x178] sm:$0xff] }
  0x33   : > { %2556 = vmatmul.mubr.msk.f32.gmra.mxu1 %vm329_vm1, %v271_v33  ;;  %2462 = vmatprep.mubr.msk.f32.mxu0 %vm329_vm1, %v208_v34  ;;  %v301_v29 = vld [vmem:[%s3130_s30 + $0x368] sm:$0xff]  ;;  %v302_v31 = vld [vmem:[%s3130_s30 + $0x370] sm:$0xff]  ;;  %v303_v33 = vld [vmem:[%s3130_s30 + $0x378] sm:$0xff] }
  0x34   : > { %2558 = vmatprep.mubr.msk.f32.mxu1 %vm329_vm1, %v272_v35  ;;  %v240_v34 = vld [vmem:[%s3130_s30 + $0x180] sm:$0xff] }
  0x35   : > { %v304_v35 = vld [vmem:[%s3130_s30 + $0x380] sm:$0xff] }
  0x36   : > { %2463 = vmatmul.mubr.msk.f32.gmra.mxu0 %vm329_vm1, %v209_v36  ;;  %v241_v36 = vld [vmem:[%s3130_s30 + $0x188] sm:$0xff] }
  0x37   : > { %2559 = vmatmul.mubr.msk.f32.gmra.mxu1 %vm329_vm1, %v273_v37  ;;  %2465 = vmatprep.mubr.msk.f32.mxu0 %vm329_vm1, %v210_v38  ;;  %v305_v37 = vld [vmem:[%s3130_s30 + $0x388] sm:$0xff]  ;;  %v242_v38 = vld [vmem:[%s3130_s30 + $0x190] sm:$0xff] }
  0x38   : > { %2561 = vmatprep.mubr.msk.f32.mxu1 %vm329_vm1, %v274_v39  ;;  %v306_v39 = vld [vmem:[%s3130_s30 + $0x390] sm:$0xff] }
  0x3a   : > { %2466 = vmatmul.mubr.msk.f32.gmra.mxu0 %vm329_vm1, %v211_v40  ;;  %v243_v40 = vld [vmem:[%s3130_s30 + $0x198] sm:$0xff] }
  0x3b   : > { %2562 = vmatmul.mubr.msk.f32.gmra.mxu1 %vm329_vm1, %v275_v41  ;;  %2468 = vmatprep.mubr.msk.f32.mxu0 %vm329_vm1, %v212_v42  ;;  %v307_v41 = vld [vmem:[%s3130_s30 + $0x398] sm:$0xff]  ;;  %v244_v42 = vld [vmem:[%s3130_s30 + $0x1a0] sm:$0xff] }
  0x3c   : > { %2564 = vmatprep.mubr.msk.f32.mxu1 %vm329_vm1, %v276_v43  ;;  %v308_v43 = vld [vmem:[%s3130_s30 + $0x3a0] sm:$0xff] }
  0x3e   : > { %2469 = vmatmul.mubr.msk.f32.gmra.mxu0 %vm329_vm1, %v213_v44  ;;  %v245_v44 = vld [vmem:[%s3130_s30 + $0x1a8] sm:$0xff] }
  0x3f   : > { %2565 = vmatmul.mubr.msk.f32.gmra.mxu1 %vm329_vm1, %v277_v45  ;;  %2471 = vmatprep.mubr.msk.f32.mxu0 %vm329_vm1, %v214_v46  ;;  %v309_v45 = vld [vmem:[%s3130_s30 + $0x3a8] sm:$0xff]  ;;  %v246_v46 = vld [vmem:[%s3130_s30 + $0x1b0] sm:$0xff] }
  0x40   : > { %2567 = vmatprep.mubr.msk.f32.mxu1 %vm329_vm1, %v278_v47  ;;  %v310_v47 = vld [vmem:[%s3130_s30 + $0x3b0] sm:$0xff] }
  0x42   : > { %2472 = vmatmul.mubr.msk.f32.gmra.mxu0 %vm329_vm1, %v215_v48  ;;  %v247_v48 = vld [vmem:[%s3130_s30 + $0x1b8] sm:$0xff] }
  0x43   : > { %2568 = vmatmul.mubr.msk.f32.gmra.mxu1 %vm329_vm1, %v279_v49  ;;  %2474 = vmatprep.mubr.msk.f32.mxu0 %vm329_vm1, %v216_v50  ;;  %v311_v49 = vld [vmem:[%s3130_s30 + $0x3b8] sm:$0xff]  ;;  %v248_v50 = vld [vmem:[%s3130_s30 + $0x1c0] sm:$0xff] }
  0x44   : > { %2570 = vmatprep.mubr.msk.f32.mxu1 %vm329_vm1, %v280_v51  ;;  %v312_v51 = vld [vmem:[%s3130_s30 + $0x3c0] sm:$0xff] }
  0x46   : > { %2475 = vmatmul.mubr.msk.f32.gmra.mxu0 %vm329_vm1, %v217_v52  ;;  %v249_v52 = vld [vmem:[%s3130_s30 + $0x1c8] sm:$0xff] }
  0x47   : > { %2571 = vmatmul.mubr.msk.f32.gmra.mxu1 %vm329_vm1, %v281_v53  ;;  %2477 = vmatprep.mubr.msk.f32.mxu0 %vm329_vm1, %v218_v54  ;;  %v313_v53 = vld [vmem:[%s3130_s30 + $0x3c8] sm:$0xff]  ;;  %v250_v54 = vld [vmem:[%s3130_s30 + $0x1d0] sm:$0xff] }
  0x48   : > { %2573 = vmatprep.mubr.msk.f32.mxu1 %vm329_vm1, %v282_v55  ;;  %v314_v55 = vld [vmem:[%s3130_s30 + $0x3d0] sm:$0xff] }
  0x4a   : > { %2478 = vmatmul.mubr.msk.f32.gmra.mxu0 %vm329_vm1, %v219_v56  ;;  %v251_v56 = vld [vmem:[%s3130_s30 + $0x1d8] sm:$0xff] }
  0x4b   : > { %2574 = vmatmul.mubr.msk.f32.gmra.mxu1 %vm329_vm1, %v283_v57  ;;  %2480 = vmatprep.mubr.msk.f32.mxu0 %vm329_vm1, %v220_v58  ;;  %v315_v57 = vld [vmem:[%s3130_s30 + $0x3d8] sm:$0xff]  ;;  %v252_v58 = vld [vmem:[%s3130_s30 + $0x1e0] sm:$0xff] }
  0x4c   : > { %2576 = vmatprep.mubr.msk.f32.mxu1 %vm329_vm1, %v284_v59  ;;  %v316_v59 = vld [vmem:[%s3130_s30 + $0x3e0] sm:$0xff] }
  0x4e   : > { %2481 = vmatmul.mubr.msk.f32.gmra.mxu0 %vm329_vm1, %v221_v60  ;;  %v253_v60 = vld [vmem:[%s3130_s30 + $0x1e8] sm:$0xff] }
  0x4f   : > { %2577 = vmatmul.mubr.msk.f32.gmra.mxu1 %vm329_vm1, %v285_v61  ;;  %2483 = vmatprep.mubr.msk.f32.mxu0 %vm329_vm1, %v222_v62  ;;  %v317_v61 = vld [vmem:[%s3130_s30 + $0x3e8] sm:$0xff]  ;;  %v254_v62 = vld [vmem:[%s3130_s30 + $0x1f0] sm:$0xff] }
  0x50   : > { %2579 = vmatprep.mubr.msk.f32.mxu1 %vm329_vm1, %v286_v63  ;;  %v318_v63 = vld [vmem:[%s3130_s30 + $0x3f0] sm:$0xff] }
  0x52   : > { %2484 = vmatmul.mubr.msk.f32.gmra.mxu0 %vm329_vm1, %v223_v0  ;;  %v255_v0 = vld [vmem:[%s3130_s30 + $0x1f8] sm:$0xff] }
  0x53   : > { %2580 = vmatmul.mubr.msk.f32.gmra.mxu1 %vm329_vm1, %v287_v1  ;;  %2486 = vmatprep.mubr.msk.f32.mxu0 %vm329_vm1, %v224_v2  ;;  %v319_v1 = vld [vmem:[%s3130_s30 + $0x3f8] sm:$0xff]  ;;  %v3391_v2 = vld [vmem:[%s3993_s2] ss:$0 sm:$0xff] }
  0x54   : > { %2582 = vmatprep.mubr.msk.f32.mxu1 %vm329_vm1, %v288_v3 }
  0x56   : > { %2487 = vmatmul.mubr.msk.f32.gmra.mxu0 %vm329_vm1, %v225_v4 }
  0x57   : > { %2583 = vmatmul.mubr.msk.f32.gmra.mxu1 %vm329_vm1, %v289_v5  ;;  %2489 = vmatprep.mubr.msk.f32.mxu0 %vm329_vm1, %v226_v6 }
  0x58   : > { %2585 = vmatprep.mubr.msk.f32.mxu1 %vm329_vm1, %v290_v7 }
  0x5a   : > { %2490 = vmatmul.mubr.msk.f32.gmra.mxu0 %vm329_vm1, %v227_v8 }
  0x5b   : > { %2586 = vmatmul.mubr.msk.f32.gmra.mxu1 %vm329_vm1, %v291_v9  ;;  %2492 = vmatprep.mubr.msk.f32.mxu0 %vm329_vm1, %v228_v10 }
  0x5c   : > { %2588 = vmatprep.mubr.msk.f32.mxu1 %vm329_vm1, %v292_v11 }
  0x5e   : > { %2493 = vmatmul.mubr.msk.f32.gmra.mxu0 %vm329_vm1, %v229_v12 }
  0x5f   : > { %2589 = vmatmul.mubr.msk.f32.gmra.mxu1 %vm329_vm1, %v293_v13  ;;  %2495 = vmatprep.mubr.msk.f32.mxu0 %vm329_vm1, %v230_v14 }
  0x60   : > { %2591 = vmatprep.mubr.msk.f32.mxu1 %vm329_vm1, %v294_v15 }
  0x62   : > { %2496 = vmatmul.mubr.msk.f32.gmra.mxu0 %vm329_vm1, %v231_v16 }
  0x63   : > { %2592 = vmatmul.mubr.msk.f32.gmra.mxu1 %vm329_vm1, %v295_v17  ;;  %2498 = vmatprep.mubr.msk.f32.mxu0 %vm329_vm1, %v232_v18 }
  0x64   : > { %2594 = vmatprep.mubr.msk.f32.mxu1 %vm329_vm1, %v296_v19 }
  0x66   : > { %2499 = vmatmul.mubr.msk.f32.gmra.mxu0 %vm329_vm1, %v233_v20 }
  0x67   : > { %2595 = vmatmul.mubr.msk.f32.gmra.mxu1 %vm329_vm1, %v297_v21  ;;  %2501 = vmatprep.mubr.msk.f32.mxu0 %vm329_vm1, %v234_v22 }
  0x68   : > { %2597 = vmatprep.mubr.msk.f32.mxu1 %vm329_vm1, %v298_v23 }
  0x6a   : > { %2502 = vmatmul.mubr.msk.f32.gmra.mxu0 %vm329_vm1, %v235_v24 }
  0x6b   : > { %2598 = vmatmul.mubr.msk.f32.gmra.mxu1 %vm329_vm1, %v299_v25  ;;  %2504 = vmatprep.mubr.msk.f32.mxu0 %vm329_vm1, %v236_v26 }
  0x6c   : > { %2600 = vmatprep.mubr.msk.f32.mxu1 %vm329_vm1, %v300_v27 }
  0x6e   : > { %2505 = vmatmul.mubr.msk.f32.gmra.mxu0 %vm329_vm1, %v237_v28 }
  0x6f   : > { %2601 = vmatmul.mubr.msk.f32.gmra.mxu1 %vm329_vm1, %v301_v29  ;;  %2507 = vmatprep.mubr.msk.f32.mxu0 %vm329_vm1, %v238_v30 }
  0x70   : > { %2603 = vmatprep.mubr.msk.f32.mxu1 %vm329_vm1, %v302_v31 }
  0x72   : > { %2508 = vmatmul.mubr.msk.f32.gmra.mxu0 %vm329_vm1, %v239_v32 }
  0x73   : > { %2604 = vmatmul.mubr.msk.f32.gmra.mxu1 %vm329_vm1, %v303_v33  ;;  %2510 = vmatprep.mubr.msk.f32.mxu0 %vm329_vm1, %v240_v34 }
  0x74   : > { %2606 = vmatprep.mubr.msk.f32.mxu1 %vm329_vm1, %v304_v35 }
  0x76   : > { %2511 = vmatmul.mubr.msk.f32.gmra.mxu0 %vm329_vm1, %v241_v36 }
  0x77   : > { %2607 = vmatmul.mubr.msk.f32.gmra.mxu1 %vm329_vm1, %v305_v37  ;;  %2513 = vmatprep.mubr.msk.f32.mxu0 %vm329_vm1, %v242_v38 }
  0x78   : > { %2609 = vmatprep.mubr.msk.f32.mxu1 %vm329_vm1, %v306_v39 }
  0x7a   : > { %2514 = vmatmul.mubr.msk.f32.gmra.mxu0 %vm329_vm1, %v243_v40 }
  0x7b   : > { %2610 = vmatmul.mubr.msk.f32.gmra.mxu1 %vm329_vm1, %v307_v41  ;;  %2516 = vmatprep.mubr.msk.f32.mxu0 %vm329_vm1, %v244_v42 }
  0x7c   : > { %2612 = vmatprep.mubr.msk.f32.mxu1 %vm329_vm1, %v308_v43 }
  0x7e   : > { %2517 = vmatmul.mubr.msk.f32.gmra.mxu0 %vm329_vm1, %v245_v44 }
  0x7f   : > { %2613 = vmatmul.mubr.msk.f32.gmra.mxu1 %vm329_vm1, %v309_v45  ;;  %2519 = vmatprep.mubr.msk.f32.mxu0 %vm329_vm1, %v246_v46 }
  0x80   : > { %2615 = vmatprep.mubr.msk.f32.mxu1 %vm329_vm1, %v310_v47 }
  0x82   : > { %2520 = vmatmul.mubr.msk.f32.gmra.mxu0 %vm329_vm1, %v247_v48 }
  0x83   : > { %2616 = vmatmul.mubr.msk.f32.gmra.mxu1 %vm329_vm1, %v311_v49  ;;  %2522 = vmatprep.mubr.msk.f32.mxu0 %vm329_vm1, %v248_v50 }
  0x84   : > { %2618 = vmatprep.mubr.msk.f32.mxu1 %vm329_vm1, %v312_v51 }
  0x86   : > { %2523 = vmatmul.mubr.msk.f32.gmra.mxu0 %vm329_vm1, %v249_v52 }
  0x87   : > { %2619 = vmatmul.mubr.msk.f32.gmra.mxu1 %vm329_vm1, %v313_v53  ;;  %2525 = vmatprep.mubr.msk.f32.mxu0 %vm329_vm1, %v250_v54 }
  0x88   : > { %2621 = vmatprep.mubr.msk.f32.mxu1 %vm329_vm1, %v314_v55 }
  0x8a   : > { %2526 = vmatmul.mubr.msk.f32.gmra.mxu0 %vm329_vm1, %v251_v56 }
  0x8b   : > { %2622 = vmatmul.mubr.msk.f32.gmra.mxu1 %vm329_vm1, %v315_v57  ;;  %2528 = vmatprep.mubr.msk.f32.mxu0 %vm329_vm1, %v252_v58 }
  0x8c   : > { %2624 = vmatprep.mubr.msk.f32.mxu1 %vm329_vm1, %v316_v59 }
  0x8e   : > { %2529 = vmatmul.mubr.msk.f32.gmra.mxu0 %vm329_vm1, %v253_v60 }
  0x8f   : > { %2625 = vmatmul.mubr.msk.f32.gmra.mxu1 %vm329_vm1, %v317_v61  ;;  %2531 = vmatprep.mubr.msk.f32.mxu0 %vm329_vm1, %v254_v62 }
  0x90   : > { %2627 = vmatprep.mubr.msk.f32.mxu1 %vm329_vm1, %v318_v63 }
  0x92   : > { %2532 = vmatmul.mubr.msk.f32.gmra.mxu0 %vm329_vm1, %v255_v0 }
  0x93   : > { %2628 = vmatmul.mubr.msk.f32.gmra.mxu1 %vm329_vm1, %v319_v1 }
  0xd6   : > { %v2440_v3 = vpop.f32.mrf.mxu0 }
  0xd7   : > { %v2536_v4 = vpop.f32.mrf.mxu1  ;;  %v790_v5 = vadd.f32 %v2440_v3, %v3391_v2 }
  0xd8   : > { %v1110_v6 = vadd.f32 %v2536_v4, %v3391_v2  ;;  %v784_v7 = vpop.f32.mrf.mxu0 }
  0xd9   : > { %v1104_v8 = vpop.f32.mrf.mxu1  ;;  %2722 = vtanh.f32 %v790_v5  ;;  %v785_v9 = vadd.f32 %v3391_v2, %v784_v7 }
  0xda   : > { %v1105_v10 = vadd.f32 %v3391_v2, %v1104_v8  ;;  %2724 = vtanh.f32 %v1110_v6  ;;  %v2443_v11 = vpop.f32.mrf.mxu0 }
  0xdb   : > { %v2539_v12 = vpop.f32.mrf.mxu1  ;;  %2726 = vtanh.f32 %v785_v9  ;;  %v800_v13 = vadd.f32 %v2443_v11, %v3391_v2 }
  0xdc   : > { %v1120_v14 = vadd.f32 %v2539_v12, %v3391_v2  ;;  %2728 = vtanh.f32 %v1105_v10  ;;  %v794_v15 = vpop.f32.mrf.mxu0 }
  0xdd   : > { %v1114_v16 = vpop.f32.mrf.mxu1  ;;  %2730 = vtanh.f32 %v800_v13  ;;  %v795_v17 = vadd.f32 %v3391_v2, %v794_v15 }
  0xde   : > { %v1115_v18 = vadd.f32 %v3391_v2, %v1114_v16  ;;  %2732 = vtanh.f32 %v1120_v14  ;;  %v2446_v19 = vpop.f32.mrf.mxu0 }
  0xdf   : > { %v2542_v20 = vpop.f32.mrf.mxu1  ;;  %2734 = vtanh.f32 %v795_v17  ;;  %v810_v21 = vadd.f32 %v2446_v19, %v3391_v2 }
  0xe0   : > { %v1130_v22 = vadd.f32 %v2542_v20, %v3391_v2  ;;  %2736 = vtanh.f32 %v1115_v18  ;;  %v804_v23 = vpop.f32.mrf.mxu0 }
  0xe1   : > { %v1124_v24 = vpop.f32.mrf.mxu1  ;;  %2738 = vtanh.f32 %v810_v21  ;;  %v805_v25 = vadd.f32 %v3391_v2, %v804_v23 }
  0xe2   : > { %v1125_v26 = vadd.f32 %v3391_v2, %v1124_v24  ;;  %2740 = vtanh.f32 %v1130_v22  ;;  %v2449_v27 = vpop.f32.mrf.mxu0 }
  0xe3   : > { %v2545_v28 = vpop.f32.mrf.mxu1  ;;  %2742 = vtanh.f32 %v805_v25  ;;  %v820_v29 = vadd.f32 %v2449_v27, %v3391_v2 }
  0xe4   : > { %v1140_v30 = vadd.f32 %v2545_v28, %v3391_v2  ;;  %2744 = vtanh.f32 %v1125_v26  ;;  %v814_v31 = vpop.f32.mrf.mxu0 }
  0xe5   : > { %v1134_v32 = vpop.f32.mrf.mxu1  ;;  %2746 = vtanh.f32 %v820_v29  ;;  %v815_v33 = vadd.f32 %v3391_v2, %v814_v31 }
  0xe6   : > { %v1135_v34 = vadd.f32 %v3391_v2, %v1134_v32  ;;  %v2723_v35 = vpop.eup %2722  ;;  %2748 = vtanh.f32 %v1140_v30  ;;  %v2452_v36 = vpop.f32.mrf.mxu0 }
  0xe7   : > { %v2548_v37 = vpop.f32.mrf.mxu1  ;;  %v2725_v38 = vpop.eup %2724  ;;  %1552 = vst.msk [vmem:[%s3410_s8 + $0x8] sm:$0xff] %vm329_vm1, %v2723_v35  ;;  %2750 = vtanh.f32 %v815_v33  ;;  %v830_v39 = vadd.f32 %v2452_v36, %v3391_v2 }
  0xe8   : > { %v1150_v40 = vadd.f32 %v2548_v37, %v3391_v2  ;;  %v2727_v41 = vpop.eup %2726  ;;  %1616 = vst.msk [vmem:[%s3410_s8 + $0x208] sm:$0xff] %vm329_vm1, %v2725_v38  ;;  %2752 = vtanh.f32 %v1135_v34  ;;  %v824_v42 = vpop.f32.mrf.mxu0 }
  0xe9   : > { %v1144_v43 = vpop.f32.mrf.mxu1  ;;  %v2729_v44 = vpop.eup %2728  ;;  %1551 = vst.msk [vmem:[%s3410_s8] sm:$0xff] %vm329_vm1, %v2727_v41  ;;  %2754 = vtanh.f32 %v830_v39  ;;  %v825_v45 = vadd.f32 %v3391_v2, %v824_v42 }
  0xea   : > { %v1145_v46 = vadd.f32 %v3391_v2, %v1144_v43  ;;  %v2731_v47 = vpop.eup %2730  ;;  %1615 = vst.msk [vmem:[%s3410_s8 + $0x200] sm:$0xff] %vm329_vm1, %v2729_v44  ;;  %2756 = vtanh.f32 %v1150_v40  ;;  %v2455_v48 = vpop.f32.mrf.mxu0 }
  0xeb   : > { %v2551_v49 = vpop.f32.mrf.mxu1  ;;  %v2733_v50 = vpop.eup %2732  ;;  %1554 = vst.msk [vmem:[%s3410_s8 + $0x18] sm:$0xff] %vm329_vm1, %v2731_v47  ;;  %2758 = vtanh.f32 %v825_v45  ;;  %v840_v51 = vadd.f32 %v2455_v48, %v3391_v2 }
  0xec   : > { %v1160_v52 = vadd.f32 %v2551_v49, %v3391_v2  ;;  %v2735_v53 = vpop.eup %2734  ;;  %1618 = vst.msk [vmem:[%s3410_s8 + $0x218] sm:$0xff] %vm329_vm1, %v2733_v50  ;;  %2760 = vtanh.f32 %v1145_v46  ;;  %v834_v54 = vpop.f32.mrf.mxu0 }
  0xed   : > { %v1154_v55 = vpop.f32.mrf.mxu1  ;;  %v2737_v56 = vpop.eup %2736  ;;  %1553 = vst.msk [vmem:[%s3410_s8 + $0x10] sm:$0xff] %vm329_vm1, %v2735_v53  ;;  %2762 = vtanh.f32 %v840_v51  ;;  %v835_v57 = vadd.f32 %v3391_v2, %v834_v54 }
  0xee   : > { %v1155_v58 = vadd.f32 %v3391_v2, %v1154_v55  ;;  %v2739_v59 = vpop.eup %2738  ;;  %1617 = vst.msk [vmem:[%s3410_s8 + $0x210] sm:$0xff] %vm329_vm1, %v2737_v56  ;;  %2764 = vtanh.f32 %v1160_v52  ;;  %v2458_v60 = vpop.f32.mrf.mxu0 }
  0xef   : > { %v2554_v61 = vpop.f32.mrf.mxu1  ;;  %v2741_v62 = vpop.eup %2740  ;;  %1556 = vst.msk [vmem:[%s3410_s8 + $0x28] sm:$0xff] %vm329_vm1, %v2739_v59  ;;  %2766 = vtanh.f32 %v835_v57  ;;  %v850_v63 = vadd.f32 %v2458_v60, %v3391_v2 }
  0xf0   : > { %v1170_v0 = vadd.f32 %v2554_v61, %v3391_v2  ;;  %v2743_v1 = vpop.eup %2742  ;;  %1620 = vst.msk [vmem:[%s3410_s8 + $0x228] sm:$0xff] %vm329_vm1, %v2741_v62  ;;  %2768 = vtanh.f32 %v1155_v58  ;;  %v844_v3 = vpop.f32.mrf.mxu0 }
  0xf1   : > { %v1164_v4 = vpop.f32.mrf.mxu1  ;;  %v2745_v5 = vpop.eup %2744  ;;  %1555 = vst.msk [vmem:[%s3410_s8 + $0x20] sm:$0xff] %vm329_vm1, %v2743_v1  ;;  %2770 = vtanh.f32 %v850_v63  ;;  %v845_v6 = vadd.f32 %v3391_v2, %v844_v3 }
  0xf2   : > { %v1165_v7 = vadd.f32 %v3391_v2, %v1164_v4  ;;  %v2747_v8 = vpop.eup %2746  ;;  %1619 = vst.msk [vmem:[%s3410_s8 + $0x220] sm:$0xff] %vm329_vm1, %v2745_v5  ;;  %2772 = vtanh.f32 %v1170_v0  ;;  %v2461_v9 = vpop.f32.mrf.mxu0 }
  0xf3   : > { %v2557_v10 = vpop.f32.mrf.mxu1  ;;  %v2749_v11 = vpop.eup %2748  ;;  %1558 = vst.msk [vmem:[%s3410_s8 + $0x38] sm:$0xff] %vm329_vm1, %v2747_v8  ;;  %2774 = vtanh.f32 %v845_v6  ;;  %v860_v12 = vadd.f32 %v2461_v9, %v3391_v2 }
  0xf4   : > { %v1180_v13 = vadd.f32 %v2557_v10, %v3391_v2  ;;  %v2751_v14 = vpop.eup %2750  ;;  %1622 = vst.msk [vmem:[%s3410_s8 + $0x238] sm:$0xff] %vm329_vm1, %v2749_v11  ;;  %2776 = vtanh.f32 %v1165_v7  ;;  %v854_v15 = vpop.f32.mrf.mxu0 }
  0xf5   : > { %v1174_v16 = vpop.f32.mrf.mxu1  ;;  %v2753_v17 = vpop.eup %2752  ;;  %1557 = vst.msk [vmem:[%s3410_s8 + $0x30] sm:$0xff] %vm329_vm1, %v2751_v14  ;;  %2778 = vtanh.f32 %v860_v12  ;;  %v855_v18 = vadd.f32 %v3391_v2, %v854_v15 }
  0xf6   : > { %v1175_v19 = vadd.f32 %v3391_v2, %v1174_v16  ;;  %v2755_v20 = vpop.eup %2754  ;;  %1621 = vst.msk [vmem:[%s3410_s8 + $0x230] sm:$0xff] %vm329_vm1, %v2753_v17  ;;  %2780 = vtanh.f32 %v1180_v13  ;;  %v2464_v21 = vpop.f32.mrf.mxu0 }
  0xf7   : > { %v2560_v22 = vpop.f32.mrf.mxu1  ;;  %v2757_v23 = vpop.eup %2756  ;;  %1560 = vst.msk [vmem:[%s3410_s8 + $0x48] sm:$0xff] %vm329_vm1, %v2755_v20  ;;  %2782 = vtanh.f32 %v855_v18  ;;  %v870_v24 = vadd.f32 %v2464_v21, %v3391_v2 }
  0xf8   : > { %v1190_v25 = vadd.f32 %v2560_v22, %v3391_v2  ;;  %v2759_v26 = vpop.eup %2758  ;;  %1624 = vst.msk [vmem:[%s3410_s8 + $0x248] sm:$0xff] %vm329_vm1, %v2757_v23  ;;  %2784 = vtanh.f32 %v1175_v19  ;;  %v864_v27 = vpop.f32.mrf.mxu0 }
  0xf9   : > { %v1184_v28 = vpop.f32.mrf.mxu1  ;;  %v2761_v29 = vpop.eup %2760  ;;  %1559 = vst.msk [vmem:[%s3410_s8 + $0x40] sm:$0xff] %vm329_vm1, %v2759_v26  ;;  %2786 = vtanh.f32 %v870_v24  ;;  %v865_v30 = vadd.f32 %v3391_v2, %v864_v27 }
  0xfa   : > { %v1185_v31 = vadd.f32 %v3391_v2, %v1184_v28  ;;  %v2763_v32 = vpop.eup %2762  ;;  %1623 = vst.msk [vmem:[%s3410_s8 + $0x240] sm:$0xff] %vm329_vm1, %v2761_v29  ;;  %2788 = vtanh.f32 %v1190_v25  ;;  %v2467_v33 = vpop.f32.mrf.mxu0 }
  0xfb   : > { %v2563_v34 = vpop.f32.mrf.mxu1  ;;  %v2765_v35 = vpop.eup %2764  ;;  %1562 = vst.msk [vmem:[%s3410_s8 + $0x58] sm:$0xff] %vm329_vm1, %v2763_v32  ;;  %2790 = vtanh.f32 %v865_v30  ;;  %v880_v36 = vadd.f32 %v2467_v33, %v3391_v2 }
  0xfc   : > { %v1200_v37 = vadd.f32 %v2563_v34, %v3391_v2  ;;  %v2767_v38 = vpop.eup %2766  ;;  %1626 = vst.msk [vmem:[%s3410_s8 + $0x258] sm:$0xff] %vm329_vm1, %v2765_v35  ;;  %2792 = vtanh.f32 %v1185_v31  ;;  %v874_v39 = vpop.f32.mrf.mxu0 }
  0xfd   : > { %v1194_v40 = vpop.f32.mrf.mxu1  ;;  %v2769_v41 = vpop.eup %2768  ;;  %1561 = vst.msk [vmem:[%s3410_s8 + $0x50] sm:$0xff] %vm329_vm1, %v2767_v38  ;;  %2794 = vtanh.f32 %v880_v36  ;;  %v875_v42 = vadd.f32 %v3391_v2, %v874_v39 }
  0xfe   : > { %v1195_v43 = vadd.f32 %v3391_v2, %v1194_v40  ;;  %v2771_v44 = vpop.eup %2770  ;;  %1625 = vst.msk [vmem:[%s3410_s8 + $0x250] sm:$0xff] %vm329_vm1, %v2769_v41  ;;  %2796 = vtanh.f32 %v1200_v37  ;;  %v2470_v45 = vpop.f32.mrf.mxu0 }
  0xff   : > { %v2566_v46 = vpop.f32.mrf.mxu1  ;;  %v2773_v47 = vpop.eup %2772  ;;  %1564 = vst.msk [vmem:[%s3410_s8 + $0x68] sm:$0xff] %vm329_vm1, %v2771_v44  ;;  %2798 = vtanh.f32 %v875_v42  ;;  %v890_v48 = vadd.f32 %v2470_v45, %v3391_v2 }
 0x100   : > { %v1210_v49 = vadd.f32 %v2566_v46, %v3391_v2  ;;  %v2775_v50 = vpop.eup %2774  ;;  %1628 = vst.msk [vmem:[%s3410_s8 + $0x268] sm:$0xff] %vm329_vm1, %v2773_v47  ;;  %2800 = vtanh.f32 %v1195_v43  ;;  %v884_v51 = vpop.f32.mrf.mxu0 }
 0x101   : > { %v1204_v52 = vpop.f32.mrf.mxu1  ;;  %v2777_v53 = vpop.eup %2776  ;;  %1563 = vst.msk [vmem:[%s3410_s8 + $0x60] sm:$0xff] %vm329_vm1, %v2775_v50  ;;  %2802 = vtanh.f32 %v890_v48  ;;  %v885_v54 = vadd.f32 %v3391_v2, %v884_v51 }
 0x102   : > { %v1205_v55 = vadd.f32 %v3391_v2, %v1204_v52  ;;  %v2779_v56 = vpop.eup %2778  ;;  %1627 = vst.msk [vmem:[%s3410_s8 + $0x260] sm:$0xff] %vm329_vm1, %v2777_v53  ;;  %2804 = vtanh.f32 %v1210_v49  ;;  %v2473_v57 = vpop.f32.mrf.mxu0 }
 0x103   : > { %v2569_v58 = vpop.f32.mrf.mxu1  ;;  %v2781_v59 = vpop.eup %2780  ;;  %1566 = vst.msk [vmem:[%s3410_s8 + $0x78] sm:$0xff] %vm329_vm1, %v2779_v56  ;;  %2806 = vtanh.f32 %v885_v54  ;;  %v900_v60 = vadd.f32 %v2473_v57, %v3391_v2 }
 0x104   : > { %v1220_v61 = vadd.f32 %v2569_v58, %v3391_v2  ;;  %v2783_v62 = vpop.eup %2782  ;;  %1630 = vst.msk [vmem:[%s3410_s8 + $0x278] sm:$0xff] %vm329_vm1, %v2781_v59  ;;  %2808 = vtanh.f32 %v1205_v55  ;;  %v894_v63 = vpop.f32.mrf.mxu0 }
 0x105   : > { %v1214_v0 = vpop.f32.mrf.mxu1  ;;  %v2785_v1 = vpop.eup %2784  ;;  %1565 = vst.msk [vmem:[%s3410_s8 + $0x70] sm:$0xff] %vm329_vm1, %v2783_v62  ;;  %2810 = vtanh.f32 %v900_v60  ;;  %v895_v3 = vadd.f32 %v3391_v2, %v894_v63 }
 0x106   : > { %v1215_v4 = vadd.f32 %v3391_v2, %v1214_v0  ;;  %v2787_v5 = vpop.eup %2786  ;;  %1629 = vst.msk [vmem:[%s3410_s8 + $0x270] sm:$0xff] %vm329_vm1, %v2785_v1  ;;  %2812 = vtanh.f32 %v1220_v61  ;;  %v2476_v6 = vpop.f32.mrf.mxu0 }
 0x107   : > { %v2572_v7 = vpop.f32.mrf.mxu1  ;;  %v2789_v8 = vpop.eup %2788  ;;  %1568 = vst.msk [vmem:[%s3410_s8 + $0x88] sm:$0xff] %vm329_vm1, %v2787_v5  ;;  %2814 = vtanh.f32 %v895_v3  ;;  %v910_v9 = vadd.f32 %v2476_v6, %v3391_v2 }
 0x108   : > { %v1230_v10 = vadd.f32 %v2572_v7, %v3391_v2  ;;  %v2791_v11 = vpop.eup %2790  ;;  %1632 = vst.msk [vmem:[%s3410_s8 + $0x288] sm:$0xff] %vm329_vm1, %v2789_v8  ;;  %2816 = vtanh.f32 %v1215_v4  ;;  %v904_v12 = vpop.f32.mrf.mxu0 }
 0x109   : > { %v1224_v13 = vpop.f32.mrf.mxu1  ;;  %v2793_v14 = vpop.eup %2792  ;;  %1567 = vst.msk [vmem:[%s3410_s8 + $0x80] sm:$0xff] %vm329_vm1, %v2791_v11  ;;  %2818 = vtanh.f32 %v910_v9  ;;  %v905_v15 = vadd.f32 %v3391_v2, %v904_v12 }
 0x10a   : > { %v1225_v16 = vadd.f32 %v3391_v2, %v1224_v13  ;;  %v2795_v17 = vpop.eup %2794  ;;  %1631 = vst.msk [vmem:[%s3410_s8 + $0x280] sm:$0xff] %vm329_vm1, %v2793_v14  ;;  %2820 = vtanh.f32 %v1230_v10  ;;  %v2479_v18 = vpop.f32.mrf.mxu0 }
 0x10b   : > { %v2575_v19 = vpop.f32.mrf.mxu1  ;;  %v2797_v20 = vpop.eup %2796  ;;  %1570 = vst.msk [vmem:[%s3410_s8 + $0x98] sm:$0xff] %vm329_vm1, %v2795_v17  ;;  %2822 = vtanh.f32 %v905_v15  ;;  %v920_v21 = vadd.f32 %v2479_v18, %v3391_v2 }
 0x10c   : > { %v1240_v22 = vadd.f32 %v2575_v19, %v3391_v2  ;;  %v2799_v23 = vpop.eup %2798  ;;  %1634 = vst.msk [vmem:[%s3410_s8 + $0x298] sm:$0xff] %vm329_vm1, %v2797_v20  ;;  %2824 = vtanh.f32 %v1225_v16  ;;  %v914_v24 = vpop.f32.mrf.mxu0 }
 0x10d   : > { %v1234_v25 = vpop.f32.mrf.mxu1  ;;  %v2801_v26 = vpop.eup %2800  ;;  %1569 = vst.msk [vmem:[%s3410_s8 + $0x90] sm:$0xff] %vm329_vm1, %v2799_v23  ;;  %2826 = vtanh.f32 %v920_v21  ;;  %v915_v27 = vadd.f32 %v3391_v2, %v914_v24 }
 0x10e   : > { %v1235_v28 = vadd.f32 %v3391_v2, %v1234_v25  ;;  %v2803_v29 = vpop.eup %2802  ;;  %1633 = vst.msk [vmem:[%s3410_s8 + $0x290] sm:$0xff] %vm329_vm1, %v2801_v26  ;;  %2828 = vtanh.f32 %v1240_v22  ;;  %v2482_v30 = vpop.f32.mrf.mxu0 }
 0x10f   : > { %v2578_v31 = vpop.f32.mrf.mxu1  ;;  %v2805_v32 = vpop.eup %2804  ;;  %1572 = vst.msk [vmem:[%s3410_s8 + $0xa8] sm:$0xff] %vm329_vm1, %v2803_v29  ;;  %2830 = vtanh.f32 %v915_v27  ;;  %v930_v33 = vadd.f32 %v2482_v30, %v3391_v2 }
 0x110   : > { %v1250_v34 = vadd.f32 %v2578_v31, %v3391_v2  ;;  %v2807_v35 = vpop.eup %2806  ;;  %1636 = vst.msk [vmem:[%s3410_s8 + $0x2a8] sm:$0xff] %vm329_vm1, %v2805_v32  ;;  %2832 = vtanh.f32 %v1235_v28  ;;  %v924_v36 = vpop.f32.mrf.mxu0 }
 0x111   : > { %v1244_v37 = vpop.f32.mrf.mxu1  ;;  %v2809_v38 = vpop.eup %2808  ;;  %1571 = vst.msk [vmem:[%s3410_s8 + $0xa0] sm:$0xff] %vm329_vm1, %v2807_v35  ;;  %2834 = vtanh.f32 %v930_v33  ;;  %v925_v39 = vadd.f32 %v3391_v2, %v924_v36 }
 0x112   : > { %v1245_v40 = vadd.f32 %v3391_v2, %v1244_v37  ;;  %v2811_v41 = vpop.eup %2810  ;;  %1635 = vst.msk [vmem:[%s3410_s8 + $0x2a0] sm:$0xff] %vm329_vm1, %v2809_v38  ;;  %2836 = vtanh.f32 %v1250_v34  ;;  %v2485_v42 = vpop.f32.mrf.mxu0 }
 0x113   : > { %v2581_v43 = vpop.f32.mrf.mxu1  ;;  %v2813_v44 = vpop.eup %2812  ;;  %1574 = vst.msk [vmem:[%s3410_s8 + $0xb8] sm:$0xff] %vm329_vm1, %v2811_v41  ;;  %2838 = vtanh.f32 %v925_v39  ;;  %v940_v45 = vadd.f32 %v2485_v42, %v3391_v2 }
 0x114   : > { %v1260_v46 = vadd.f32 %v2581_v43, %v3391_v2  ;;  %v2815_v47 = vpop.eup %2814  ;;  %1638 = vst.msk [vmem:[%s3410_s8 + $0x2b8] sm:$0xff] %vm329_vm1, %v2813_v44  ;;  %2840 = vtanh.f32 %v1245_v40  ;;  %v934_v48 = vpop.f32.mrf.mxu0 }
 0x115   : > { %v1254_v49 = vpop.f32.mrf.mxu1  ;;  %v2817_v50 = vpop.eup %2816  ;;  %1573 = vst.msk [vmem:[%s3410_s8 + $0xb0] sm:$0xff] %vm329_vm1, %v2815_v47  ;;  %2842 = vtanh.f32 %v940_v45  ;;  %v935_v51 = vadd.f32 %v3391_v2, %v934_v48 }
 0x116   : > { %v1255_v52 = vadd.f32 %v3391_v2, %v1254_v49  ;;  %v2819_v53 = vpop.eup %2818  ;;  %1637 = vst.msk [vmem:[%s3410_s8 + $0x2b0] sm:$0xff] %vm329_vm1, %v2817_v50  ;;  %2844 = vtanh.f32 %v1260_v46  ;;  %v2488_v54 = vpop.f32.mrf.mxu0 }
 0x117   : > { %v2584_v55 = vpop.f32.mrf.mxu1  ;;  %v2821_v56 = vpop.eup %2820  ;;  %1576 = vst.msk [vmem:[%s3410_s8 + $0xc8] sm:$0xff] %vm329_vm1, %v2819_v53  ;;  %2846 = vtanh.f32 %v935_v51  ;;  %v950_v57 = vadd.f32 %v2488_v54, %v3391_v2 }
 0x118   : > { %v1270_v58 = vadd.f32 %v2584_v55, %v3391_v2  ;;  %v2823_v59 = vpop.eup %2822  ;;  %1640 = vst.msk [vmem:[%s3410_s8 + $0x2c8] sm:$0xff] %vm329_vm1, %v2821_v56  ;;  %2848 = vtanh.f32 %v1255_v52  ;;  %v944_v60 = vpop.f32.mrf.mxu0 }
 0x119   : > { %v1264_v61 = vpop.f32.mrf.mxu1  ;;  %v2825_v62 = vpop.eup %2824  ;;  %1575 = vst.msk [vmem:[%s3410_s8 + $0xc0] sm:$0xff] %vm329_vm1, %v2823_v59  ;;  %2850 = vtanh.f32 %v950_v57  ;;  %v945_v63 = vadd.f32 %v3391_v2, %v944_v60 }
 0x11a   : > { %v1265_v0 = vadd.f32 %v3391_v2, %v1264_v61  ;;  %v2827_v1 = vpop.eup %2826  ;;  %1639 = vst.msk [vmem:[%s3410_s8 + $0x2c0] sm:$0xff] %vm329_vm1, %v2825_v62  ;;  %2852 = vtanh.f32 %v1270_v58  ;;  %v2491_v3 = vpop.f32.mrf.mxu0 }
 0x11b   : > { %v2587_v4 = vpop.f32.mrf.mxu1  ;;  %v2829_v5 = vpop.eup %2828  ;;  %1578 = vst.msk [vmem:[%s3410_s8 + $0xd8] sm:$0xff] %vm329_vm1, %v2827_v1  ;;  %2854 = vtanh.f32 %v945_v63  ;;  %v960_v6 = vadd.f32 %v2491_v3, %v3391_v2 }
 0x11c   : > { %v1280_v7 = vadd.f32 %v2587_v4, %v3391_v2  ;;  %v2831_v8 = vpop.eup %2830  ;;  %1642 = vst.msk [vmem:[%s3410_s8 + $0x2d8] sm:$0xff] %vm329_vm1, %v2829_v5  ;;  %2856 = vtanh.f32 %v1265_v0  ;;  %v954_v9 = vpop.f32.mrf.mxu0 }
 0x11d   : > { %v1274_v10 = vpop.f32.mrf.mxu1  ;;  %v2833_v11 = vpop.eup %2832  ;;  %1577 = vst.msk [vmem:[%s3410_s8 + $0xd0] sm:$0xff] %vm329_vm1, %v2831_v8  ;;  %2858 = vtanh.f32 %v960_v6  ;;  %v955_v12 = vadd.f32 %v3391_v2, %v954_v9 }
 0x11e   : > { %v1275_v13 = vadd.f32 %v3391_v2, %v1274_v10  ;;  %v2835_v14 = vpop.eup %2834  ;;  %1641 = vst.msk [vmem:[%s3410_s8 + $0x2d0] sm:$0xff] %vm329_vm1, %v2833_v11  ;;  %2860 = vtanh.f32 %v1280_v7  ;;  %v2494_v15 = vpop.f32.mrf.mxu0 }
 0x11f   : > { %v2590_v16 = vpop.f32.mrf.mxu1  ;;  %v2837_v17 = vpop.eup %2836  ;;  %1580 = vst.msk [vmem:[%s3410_s8 + $0xe8] sm:$0xff] %vm329_vm1, %v2835_v14  ;;  %2862 = vtanh.f32 %v955_v12  ;;  %v970_v18 = vadd.f32 %v2494_v15, %v3391_v2 }
 0x120   : > { %v1290_v19 = vadd.f32 %v2590_v16, %v3391_v2  ;;  %v2839_v20 = vpop.eup %2838  ;;  %1644 = vst.msk [vmem:[%s3410_s8 + $0x2e8] sm:$0xff] %vm329_vm1, %v2837_v17  ;;  %2864 = vtanh.f32 %v1275_v13  ;;  %v964_v21 = vpop.f32.mrf.mxu0 }
 0x121   : > { %v1284_v22 = vpop.f32.mrf.mxu1  ;;  %v2841_v23 = vpop.eup %2840  ;;  %1579 = vst.msk [vmem:[%s3410_s8 + $0xe0] sm:$0xff] %vm329_vm1, %v2839_v20  ;;  %2866 = vtanh.f32 %v970_v18  ;;  %v965_v24 = vadd.f32 %v3391_v2, %v964_v21 }
 0x122   : > { %v1285_v25 = vadd.f32 %v3391_v2, %v1284_v22  ;;  %v2843_v26 = vpop.eup %2842  ;;  %1643 = vst.msk [vmem:[%s3410_s8 + $0x2e0] sm:$0xff] %vm329_vm1, %v2841_v23  ;;  %2868 = vtanh.f32 %v1290_v19  ;;  %v2497_v27 = vpop.f32.mrf.mxu0 }
 0x123   : > { %v2593_v28 = vpop.f32.mrf.mxu1  ;;  %v2845_v29 = vpop.eup %2844  ;;  %1582 = vst.msk [vmem:[%s3410_s8 + $0xf8] sm:$0xff] %vm329_vm1, %v2843_v26  ;;  %2870 = vtanh.f32 %v965_v24  ;;  %v980_v30 = vadd.f32 %v2497_v27, %v3391_v2 }
 0x124   : > { %v1300_v31 = vadd.f32 %v2593_v28, %v3391_v2  ;;  %v2847_v32 = vpop.eup %2846  ;;  %1646 = vst.msk [vmem:[%s3410_s8 + $0x2f8] sm:$0xff] %vm329_vm1, %v2845_v29  ;;  %2872 = vtanh.f32 %v1285_v25  ;;  %v974_v33 = vpop.f32.mrf.mxu0 }
 0x125   : > { %v1294_v34 = vpop.f32.mrf.mxu1  ;;  %v2849_v35 = vpop.eup %2848  ;;  %1581 = vst.msk [vmem:[%s3410_s8 + $0xf0] sm:$0xff] %vm329_vm1, %v2847_v32  ;;  %2874 = vtanh.f32 %v980_v30  ;;  %v975_v36 = vadd.f32 %v3391_v2, %v974_v33 }
 0x126   : > { %v1295_v37 = vadd.f32 %v3391_v2, %v1294_v34  ;;  %v2851_v38 = vpop.eup %2850  ;;  %1645 = vst.msk [vmem:[%s3410_s8 + $0x2f0] sm:$0xff] %vm329_vm1, %v2849_v35  ;;  %2876 = vtanh.f32 %v1300_v31  ;;  %v2500_v39 = vpop.f32.mrf.mxu0 }
 0x127   : > { %v2596_v40 = vpop.f32.mrf.mxu1  ;;  %v2853_v41 = vpop.eup %2852  ;;  %1584 = vst.msk [vmem:[%s3410_s8 + $0x108] sm:$0xff] %vm329_vm1, %v2851_v38  ;;  %2878 = vtanh.f32 %v975_v36  ;;  %v990_v42 = vadd.f32 %v2500_v39, %v3391_v2 }
 0x128   : > { %v1310_v43 = vadd.f32 %v2596_v40, %v3391_v2  ;;  %v2855_v44 = vpop.eup %2854  ;;  %1648 = vst.msk [vmem:[%s3410_s8 + $0x308] sm:$0xff] %vm329_vm1, %v2853_v41  ;;  %2880 = vtanh.f32 %v1295_v37  ;;  %v984_v45 = vpop.f32.mrf.mxu0 }
 0x129   : > { %v1304_v46 = vpop.f32.mrf.mxu1  ;;  %v2857_v47 = vpop.eup %2856  ;;  %1583 = vst.msk [vmem:[%s3410_s8 + $0x100] sm:$0xff] %vm329_vm1, %v2855_v44  ;;  %2882 = vtanh.f32 %v990_v42  ;;  %v985_v48 = vadd.f32 %v3391_v2, %v984_v45 }
 0x12a   : > { %v1305_v49 = vadd.f32 %v3391_v2, %v1304_v46  ;;  %v2859_v50 = vpop.eup %2858  ;;  %1647 = vst.msk [vmem:[%s3410_s8 + $0x300] sm:$0xff] %vm329_vm1, %v2857_v47  ;;  %2884 = vtanh.f32 %v1310_v43  ;;  %v2503_v51 = vpop.f32.mrf.mxu0 }
 0x12b   : > { %v2599_v52 = vpop.f32.mrf.mxu1  ;;  %v2861_v53 = vpop.eup %2860  ;;  %1586 = vst.msk [vmem:[%s3410_s8 + $0x118] sm:$0xff] %vm329_vm1, %v2859_v50  ;;  %2886 = vtanh.f32 %v985_v48  ;;  %v1000_v54 = vadd.f32 %v2503_v51, %v3391_v2 }
 0x12c   : > { %v1320_v55 = vadd.f32 %v2599_v52, %v3391_v2  ;;  %v2863_v56 = vpop.eup %2862  ;;  %1650 = vst.msk [vmem:[%s3410_s8 + $0x318] sm:$0xff] %vm329_vm1, %v2861_v53  ;;  %2888 = vtanh.f32 %v1305_v49  ;;  %v994_v57 = vpop.f32.mrf.mxu0 }
 0x12d   : > { %v1314_v58 = vpop.f32.mrf.mxu1  ;;  %v2865_v59 = vpop.eup %2864  ;;  %1585 = vst.msk [vmem:[%s3410_s8 + $0x110] sm:$0xff] %vm329_vm1, %v2863_v56  ;;  %2890 = vtanh.f32 %v1000_v54  ;;  %v995_v60 = vadd.f32 %v3391_v2, %v994_v57 }
 0x12e   : > { %v1315_v61 = vadd.f32 %v3391_v2, %v1314_v58  ;;  %v2867_v62 = vpop.eup %2866  ;;  %1649 = vst.msk [vmem:[%s3410_s8 + $0x310] sm:$0xff] %vm329_vm1, %v2865_v59  ;;  %2892 = vtanh.f32 %v1320_v55  ;;  %v2506_v63 = vpop.f32.mrf.mxu0 }
 0x12f   : > { %v2602_v0 = vpop.f32.mrf.mxu1  ;;  %v2869_v1 = vpop.eup %2868  ;;  %1588 = vst.msk [vmem:[%s3410_s8 + $0x128] sm:$0xff] %vm329_vm1, %v2867_v62  ;;  %2894 = vtanh.f32 %v995_v60  ;;  %v1010_v3 = vadd.f32 %v2506_v63, %v3391_v2  ;;  %v3693_v63 = vld [vmem:[%s3993_s2] ss:$0 sm:$0xff] }
 0x130   : > { %v1330_v4 = vadd.f32 %v2602_v0, %v3391_v2  ;;  %v2871_v5 = vpop.eup %2870  ;;  %1652 = vst.msk [vmem:[%s3410_s8 + $0x328] sm:$0xff] %vm329_vm1, %v2869_v1  ;;  %2896 = vtanh.f32 %v1315_v61  ;;  %v1004_v6 = vpop.f32.mrf.mxu0 }
 0x131   : > { %v1324_v7 = vpop.f32.mrf.mxu1  ;;  %v2873_v8 = vpop.eup %2872  ;;  %1587 = vst.msk [vmem:[%s3410_s8 + $0x120] sm:$0xff] %vm329_vm1, %v2871_v5  ;;  %2898 = vtanh.f32 %v1010_v3  ;;  %v1005_v9 = vadd.f32 %v3391_v2, %v1004_v6 }
 0x132   : > { %v1325_v10 = vadd.f32 %v3391_v2, %v1324_v7  ;;  %v2875_v11 = vpop.eup %2874  ;;  %1651 = vst.msk [vmem:[%s3410_s8 + $0x320] sm:$0xff] %vm329_vm1, %v2873_v8  ;;  %2900 = vtanh.f32 %v1330_v4  ;;  %v2509_v12 = vpop.f32.mrf.mxu0 }
 0x133   : > { %v2605_v13 = vpop.f32.mrf.mxu1  ;;  %v2877_v14 = vpop.eup %2876  ;;  %1590 = vst.msk [vmem:[%s3410_s8 + $0x138] sm:$0xff] %vm329_vm1, %v2875_v11  ;;  %2902 = vtanh.f32 %v1005_v9  ;;  %v1020_v15 = vadd.f32 %v2509_v12, %v3391_v2 }
 0x134   : > { %v1340_v16 = vadd.f32 %v2605_v13, %v3391_v2  ;;  %v2879_v17 = vpop.eup %2878  ;;  %1654 = vst.msk [vmem:[%s3410_s8 + $0x338] sm:$0xff] %vm329_vm1, %v2877_v14  ;;  %2904 = vtanh.f32 %v1325_v10  ;;  %v1014_v18 = vpop.f32.mrf.mxu0 }
 0x135   : > { %v1334_v19 = vpop.f32.mrf.mxu1  ;;  %v2881_v20 = vpop.eup %2880  ;;  %1589 = vst.msk [vmem:[%s3410_s8 + $0x130] sm:$0xff] %vm329_vm1, %v2879_v17  ;;  %2906 = vtanh.f32 %v1020_v15  ;;  %v1015_v21 = vadd.f32 %v3391_v2, %v1014_v18 }
 0x136   : > { %v1335_v22 = vadd.f32 %v3391_v2, %v1334_v19  ;;  %v2883_v23 = vpop.eup %2882  ;;  %1653 = vst.msk [vmem:[%s3410_s8 + $0x330] sm:$0xff] %vm329_vm1, %v2881_v20  ;;  %2908 = vtanh.f32 %v1340_v16  ;;  %v2512_v24 = vpop.f32.mrf.mxu0 }
 0x137   : > { %v2608_v25 = vpop.f32.mrf.mxu1  ;;  %v2885_v26 = vpop.eup %2884  ;;  %1592 = vst.msk [vmem:[%s3410_s8 + $0x148] sm:$0xff] %vm329_vm1, %v2883_v23  ;;  %2910 = vtanh.f32 %v1015_v21  ;;  %v1030_v27 = vadd.f32 %v2512_v24, %v3391_v2 }
 0x138   : > { %v1350_v28 = vadd.f32 %v2608_v25, %v3391_v2  ;;  %v2887_v29 = vpop.eup %2886  ;;  %1656 = vst.msk [vmem:[%s3410_s8 + $0x348] sm:$0xff] %vm329_vm1, %v2885_v26  ;;  %2912 = vtanh.f32 %v1335_v22  ;;  %v1024_v30 = vpop.f32.mrf.mxu0 }
 0x139   : > { %v1344_v31 = vpop.f32.mrf.mxu1  ;;  %v2889_v32 = vpop.eup %2888  ;;  %1591 = vst.msk [vmem:[%s3410_s8 + $0x140] sm:$0xff] %vm329_vm1, %v2887_v29  ;;  %2914 = vtanh.f32 %v1030_v27  ;;  %v1025_v33 = vadd.f32 %v3391_v2, %v1024_v30 }
 0x13a   : > { %v1345_v34 = vadd.f32 %v3391_v2, %v1344_v31  ;;  %v2891_v35 = vpop.eup %2890  ;;  %1655 = vst.msk [vmem:[%s3410_s8 + $0x340] sm:$0xff] %vm329_vm1, %v2889_v32  ;;  %2916 = vtanh.f32 %v1350_v28  ;;  %v2515_v36 = vpop.f32.mrf.mxu0 }
 0x13b   : > { %v2611_v37 = vpop.f32.mrf.mxu1  ;;  %v2893_v38 = vpop.eup %2892  ;;  %1594 = vst.msk [vmem:[%s3410_s8 + $0x158] sm:$0xff] %vm329_vm1, %v2891_v35  ;;  %2918 = vtanh.f32 %v1025_v33  ;;  %v1040_v39 = vadd.f32 %v2515_v36, %v3391_v2 }
 0x13c   : > { %v1360_v40 = vadd.f32 %v2611_v37, %v3391_v2  ;;  %v2895_v41 = vpop.eup %2894  ;;  %1658 = vst.msk [vmem:[%s3410_s8 + $0x358] sm:$0xff] %vm329_vm1, %v2893_v38  ;;  %2920 = vtanh.f32 %v1345_v34  ;;  %v1034_v42 = vpop.f32.mrf.mxu0 }
 0x13d   : > { %v1354_v43 = vpop.f32.mrf.mxu1  ;;  %v2897_v44 = vpop.eup %2896  ;;  %1593 = vst.msk [vmem:[%s3410_s8 + $0x150] sm:$0xff] %vm329_vm1, %v2895_v41  ;;  %2922 = vtanh.f32 %v1040_v39  ;;  %v1035_v45 = vadd.f32 %v3391_v2, %v1034_v42 }
 0x13e   : > { %v1355_v46 = vadd.f32 %v3391_v2, %v1354_v43  ;;  %v2899_v47 = vpop.eup %2898  ;;  %1657 = vst.msk [vmem:[%s3410_s8 + $0x350] sm:$0xff] %vm329_vm1, %v2897_v44  ;;  %2924 = vtanh.f32 %v1360_v40  ;;  %v2518_v48 = vpop.f32.mrf.mxu0 }
 0x13f   : > { %v2614_v49 = vpop.f32.mrf.mxu1  ;;  %v2901_v50 = vpop.eup %2900  ;;  %1596 = vst.msk [vmem:[%s3410_s8 + $0x168] sm:$0xff] %vm329_vm1, %v2899_v47  ;;  %2926 = vtanh.f32 %v1035_v45  ;;  %v1050_v51 = vadd.f32 %v2518_v48, %v3391_v2 }
 0x140   : > { %v1370_v52 = vadd.f32 %v2614_v49, %v3391_v2  ;;  %v2903_v53 = vpop.eup %2902  ;;  %1660 = vst.msk [vmem:[%s3410_s8 + $0x368] sm:$0xff] %vm329_vm1, %v2901_v50  ;;  %2928 = vtanh.f32 %v1355_v46  ;;  %v1044_v54 = vpop.f32.mrf.mxu0 }
 0x141   : > { %v1364_v55 = vpop.f32.mrf.mxu1  ;;  %v2905_v56 = vpop.eup %2904  ;;  %1595 = vst.msk [vmem:[%s3410_s8 + $0x160] sm:$0xff] %vm329_vm1, %v2903_v53  ;;  %2930 = vtanh.f32 %v1050_v51  ;;  %v1045_v57 = vadd.f32 %v3391_v2, %v1044_v54 }
 0x142   : > { %v1365_v58 = vadd.f32 %v3391_v2, %v1364_v55  ;;  %v2907_v59 = vpop.eup %2906  ;;  %1659 = vst.msk [vmem:[%s3410_s8 + $0x360] sm:$0xff] %vm329_vm1, %v2905_v56  ;;  %2932 = vtanh.f32 %v1370_v52  ;;  %v2521_v60 = vpop.f32.mrf.mxu0 }
 0x143   : > { %v2617_v61 = vpop.f32.mrf.mxu1  ;;  %v2909_v62 = vpop.eup %2908  ;;  %1598 = vst.msk [vmem:[%s3410_s8 + $0x178] sm:$0xff] %vm329_vm1, %v2907_v59  ;;  %2934 = vtanh.f32 %v1045_v57  ;;  %v1060_v0 = vadd.f32 %v3693_v63, %v2521_v60 }
 0x144   : > { %v1380_v2 = vadd.f32 %v3693_v63, %v2617_v61  ;;  %v2911_v1 = vpop.eup %2910  ;;  %1662 = vst.msk [vmem:[%s3410_s8 + $0x378] sm:$0xff] %vm329_vm1, %v2909_v62  ;;  %2936 = vtanh.f32 %v1365_v58  ;;  %v1054_v3 = vpop.f32.mrf.mxu0 }
 0x145   : > { %v1374_v4 = vpop.f32.mrf.mxu1  ;;  %v2913_v5 = vpop.eup %2912  ;;  %1597 = vst.msk [vmem:[%s3410_s8 + $0x170] sm:$0xff] %vm329_vm1, %v2911_v1  ;;  %2938 = vtanh.f32 %v1060_v0  ;;  %v1055_v6 = vadd.f32 %v3693_v63, %v1054_v3 }
 0x146   : > { %v1375_v7 = vadd.f32 %v3693_v63, %v1374_v4  ;;  %v2915_v8 = vpop.eup %2914  ;;  %1661 = vst.msk [vmem:[%s3410_s8 + $0x370] sm:$0xff] %vm329_vm1, %v2913_v5  ;;  %2940 = vtanh.f32 %v1380_v2  ;;  %v2524_v9 = vpop.f32.mrf.mxu0 }
 0x147   : > { %v2620_v10 = vpop.f32.mrf.mxu1  ;;  %v2917_v11 = vpop.eup %2916  ;;  %1600 = vst.msk [vmem:[%s3410_s8 + $0x188] sm:$0xff] %vm329_vm1, %v2915_v8  ;;  %2942 = vtanh.f32 %v1055_v6  ;;  %v1070_v12 = vadd.f32 %v3693_v63, %v2524_v9 }
 0x148   : > { %v1390_v13 = vadd.f32 %v3693_v63, %v2620_v10  ;;  %v2919_v14 = vpop.eup %2918  ;;  %1664 = vst.msk [vmem:[%s3410_s8 + $0x388] sm:$0xff] %vm329_vm1, %v2917_v11  ;;  %2944 = vtanh.f32 %v1375_v7  ;;  %v1064_v15 = vpop.f32.mrf.mxu0 }
 0x149   : > { %v1384_v16 = vpop.f32.mrf.mxu1  ;;  %v2921_v17 = vpop.eup %2920  ;;  %1599 = vst.msk [vmem:[%s3410_s8 + $0x180] sm:$0xff] %vm329_vm1, %v2919_v14  ;;  %2946 = vtanh.f32 %v1070_v12  ;;  %v1065_v18 = vadd.f32 %v3693_v63, %v1064_v15 }
 0x14a   : > { %v1385_v19 = vadd.f32 %v3693_v63, %v1384_v16  ;;  %v2923_v20 = vpop.eup %2922  ;;  %1663 = vst.msk [vmem:[%s3410_s8 + $0x380] sm:$0xff] %vm329_vm1, %v2921_v17  ;;  %2948 = vtanh.f32 %v1390_v13  ;;  %v2527_v21 = vpop.f32.mrf.mxu0 }
 0x14b   : > { %v2623_v22 = vpop.f32.mrf.mxu1  ;;  %v2925_v23 = vpop.eup %2924  ;;  %1602 = vst.msk [vmem:[%s3410_s8 + $0x198] sm:$0xff] %vm329_vm1, %v2923_v20  ;;  %2950 = vtanh.f32 %v1065_v18  ;;  %v1080_v24 = vadd.f32 %v3693_v63, %v2527_v21 }
 0x14c   : > { %v1400_v25 = vadd.f32 %v3693_v63, %v2623_v22  ;;  %v2927_v26 = vpop.eup %2926  ;;  %1666 = vst.msk [vmem:[%s3410_s8 + $0x398] sm:$0xff] %vm329_vm1, %v2925_v23  ;;  %2952 = vtanh.f32 %v1385_v19  ;;  %v1074_v27 = vpop.f32.mrf.mxu0 }
 0x14d   : > { %v1394_v28 = vpop.f32.mrf.mxu1  ;;  %v2929_v29 = vpop.eup %2928  ;;  %1601 = vst.msk [vmem:[%s3410_s8 + $0x190] sm:$0xff] %vm329_vm1, %v2927_v26  ;;  %2954 = vtanh.f32 %v1080_v24  ;;  %v1075_v30 = vadd.f32 %v3693_v63, %v1074_v27 }
 0x14e   : > { %v1395_v31 = vadd.f32 %v3693_v63, %v1394_v28  ;;  %v2931_v32 = vpop.eup %2930  ;;  %1665 = vst.msk [vmem:[%s3410_s8 + $0x390] sm:$0xff] %vm329_vm1, %v2929_v29  ;;  %2956 = vtanh.f32 %v1400_v25  ;;  %v2530_v33 = vpop.f32.mrf.mxu0 }
 0x14f   : > { %v2626_v34 = vpop.f32.mrf.mxu1  ;;  %v2933_v35 = vpop.eup %2932  ;;  %1604 = vst.msk [vmem:[%s3410_s8 + $0x1a8] sm:$0xff] %vm329_vm1, %v2931_v32  ;;  %2958 = vtanh.f32 %v1075_v30  ;;  %v1090_v36 = vadd.f32 %v3693_v63, %v2530_v33 }
 0x150   : > { %v1410_v37 = vadd.f32 %v3693_v63, %v2626_v34  ;;  %v2935_v38 = vpop.eup %2934  ;;  %1668 = vst.msk [vmem:[%s3410_s8 + $0x3a8] sm:$0xff] %vm329_vm1, %v2933_v35  ;;  %2960 = vtanh.f32 %v1395_v31  ;;  %v1084_v39 = vpop.f32.mrf.mxu0 }
 0x151   : > { %v1404_v40 = vpop.f32.mrf.mxu1  ;;  %v2937_v41 = vpop.eup %2936  ;;  %1603 = vst.msk [vmem:[%s3410_s8 + $0x1a0] sm:$0xff] %vm329_vm1, %v2935_v38  ;;  %2962 = vtanh.f32 %v1090_v36  ;;  %v1085_v42 = vadd.f32 %v3693_v63, %v1084_v39 }
 0x152   : > { %v1405_v43 = vadd.f32 %v3693_v63, %v1404_v40  ;;  %v2939_v44 = vpop.eup %2938  ;;  %1667 = vst.msk [vmem:[%s3410_s8 + $0x3a0] sm:$0xff] %vm329_vm1, %v2937_v41  ;;  %2964 = vtanh.f32 %v1410_v37  ;;  %v2533_v45 = vpop.f32.mrf.mxu0 }
 0x153   : > { %v2629_v46 = vpop.f32.mrf.mxu1  ;;  %v2941_v47 = vpop.eup %2940  ;;  %1606 = vst.msk [vmem:[%s3410_s8 + $0x1b8] sm:$0xff] %vm329_vm1, %v2939_v44  ;;  %2966 = vtanh.f32 %v1085_v42  ;;  %v1100_v48 = vadd.f32 %v3693_v63, %v2533_v45 }
 0x154   : > { %v1420_v49 = vadd.f32 %v3693_v63, %v2629_v46  ;;  %v2943_v50 = vpop.eup %2942  ;;  %1670 = vst.msk [vmem:[%s3410_s8 + $0x3b8] sm:$0xff] %vm329_vm1, %v2941_v47  ;;  %2968 = vtanh.f32 %v1405_v43  ;;  %v1094_v51 = vpop.f32.mrf.mxu0 }
 0x155   : > { %v1414_v52 = vpop.f32.mrf.mxu1  ;;  %v2945_v53 = vpop.eup %2944  ;;  %1605 = vst.msk [vmem:[%s3410_s8 + $0x1b0] sm:$0xff] %vm329_vm1, %v2943_v50  ;;  %2970 = vtanh.f32 %v1100_v48  ;;  %v1095_v54 = vadd.f32 %v3693_v63, %v1094_v51 }
 0x156   : > { %v1415_v55 = vadd.f32 %v3693_v63, %v1414_v52  ;;  %v2947_v56 = vpop.eup %2946  ;;  %1669 = vst.msk [vmem:[%s3410_s8 + $0x3b0] sm:$0xff] %vm329_vm1, %v2945_v53  ;;  %2972 = vtanh.f32 %v1420_v49 }
 0x157   : > { %v2949_v57 = vpop.eup %2948  ;;  %1608 = vst.msk [vmem:[%s3410_s8 + $0x1c8] sm:$0xff] %vm329_vm1, %v2947_v56  ;;  %2974 = vtanh.f32 %v1095_v54 }
 0x158   : > { %v2951_v58 = vpop.eup %2950  ;;  %1672 = vst.msk [vmem:[%s3410_s8 + $0x3c8] sm:$0xff] %vm329_vm1, %v2949_v57  ;;  %2976 = vtanh.f32 %v1415_v55 }
 0x159   : > { %v2953_v59 = vpop.eup %2952  ;;  %1607 = vst.msk [vmem:[%s3410_s8 + $0x1c0] sm:$0xff] %vm329_vm1, %v2951_v58 }
 0x15a   : > { %v2955_v60 = vpop.eup %2954  ;;  %1671 = vst.msk [vmem:[%s3410_s8 + $0x3c0] sm:$0xff] %vm329_vm1, %v2953_v59 }
 0x15b   : > { %v2957_v61 = vpop.eup %2956  ;;  %1610 = vst.msk [vmem:[%s3410_s8 + $0x1d8] sm:$0xff] %vm329_vm1, %v2955_v60 }
 0x15c   : > { %v2959_v62 = vpop.eup %2958  ;;  %1674 = vst.msk [vmem:[%s3410_s8 + $0x3d8] sm:$0xff] %vm329_vm1, %v2957_v61 }
 0x15d   : > { %v2961_v63 = vpop.eup %2960  ;;  %1609 = vst.msk [vmem:[%s3410_s8 + $0x1d0] sm:$0xff] %vm329_vm1, %v2959_v62 }
 0x15e   : > { %v2963_v0 = vpop.eup %2962  ;;  %1673 = vst.msk [vmem:[%s3410_s8 + $0x3d0] sm:$0xff] %vm329_vm1, %v2961_v63 }
 0x15f   : > { %v2965_v2 = vpop.eup %2964  ;;  %1612 = vst.msk [vmem:[%s3410_s8 + $0x1e8] sm:$0xff] %vm329_vm1, %v2963_v0 }
 0x160   : > { %v2967_v1 = vpop.eup %2966  ;;  %1676 = vst.msk [vmem:[%s3410_s8 + $0x3e8] sm:$0xff] %vm329_vm1, %v2965_v2 }
 0x161   : > { %v2969_v3 = vpop.eup %2968  ;;  %1611 = vst.msk [vmem:[%s3410_s8 + $0x1e0] sm:$0xff] %vm329_vm1, %v2967_v1 }
 0x162   : > { %v2971_v4 = vpop.eup %2970  ;;  %1675 = vst.msk [vmem:[%s3410_s8 + $0x3e0] sm:$0xff] %vm329_vm1, %v2969_v3  ;;  %1685 = sbr.rel (!%p3112_p4) target bundleno = 423 (0x1a7), region = 36 }
 0x163   : > { %v2973_v5 = vpop.eup %2972  ;;  %1614 = vst.msk [vmem:[%s3410_s8 + $0x1f8] sm:$0xff] %vm329_vm1, %v2971_v4 }
 0x164   : > { %v2975_v6 = vpop.eup %2974  ;;  %1678 = vst.msk [vmem:[%s3410_s8 + $0x3f8] sm:$0xff] %vm329_vm1, %v2973_v5 }
 0x165   : > { %v2977_v7 = vpop.eup %2976  ;;  %1613 = vst.msk [vmem:[%s3410_s8 + $0x1f0] sm:$0xff] %vm329_vm1, %v2975_v6 }
 0x166   : > { %1677 = vst.msk [vmem:[%s3410_s8 + $0x3f0] sm:$0xff] %vm329_vm1, %v2977_v7 }
 0x167   : > { %s4005_s11 = smov (!%p1688_p8, %s1687_s11), 128 }
 0x168   : > { %s2286_s21 = sshll.u32 %s4005_s11, 7 }
 0x169   : > { %p2289_p9 = scmp.eq.s32.totalorder %s2286_s21, 0 }
 0x16a   : > { %s3798_s22 = sshrl.u32 (!%p2289_p9), %s4005_s11, 6 }
 0x16b   : > { %1696 = sbr.rel (%p2289_p9) target bundleno = 423 (0x1a7), region = 40  ;;  %p2290_p10 = scmp.le.s32.totalorder (!%p2289_p9), %s3798_s22, 0 }
 0x170   : > { %2103 = sbr.rel (%p2290_p10) target bundleno = 406 (0x196), region = 116  ;;  %s3996_s15 = smov (!%p2290_p10), %s3792_s18 }
 0x171   : > { %s3997_s20 = smov (!%p2290_p10), %s3410_s8  ;;  %s3807_s23 = smov (!%p2290_p10), 0  }
 0x172   : > { %s3809_s24 = smov (!%p2290_p10), 0  }
 0x175 LB: >> { %v1885_v8 = vld [vmem:[%s3041_s20] sm:$0xff]  ;;  %v1887_v9 = vld [vmem:[%s3041_s20 + $0x8] sm:$0xff]  ;;  %v1889_v10 = vld [vmem:[%s3041_s20 + $0x10] sm:$0xff]  ;;  %s2013_s25 = sadd.s32 1, %s3045_s23  ;;  %s1879_s24 = sadd.s32 1, %s3049_s24   ;;  %s3049_s24 = sphi %s3809_s24, %s1879_s24   ;;  %s3045_s23 = sphi %s3807_s23, %s4000_s23   ;;  %s3041_s20 = sphi %s3997_s20, %s3999_s20   ;;  %s3037_s15 = sphi %s3996_s15, %s3998_s15  }
 0x176   : >> { %1886 = vst [vmem:[%s3037_s15] sm:$0xff] %v1885_v8  ;;  %1888 = vst [vmem:[%s3037_s15 + $0x8] sm:$0xff] %v1887_v9  ;;  %v1891_v11 = vld [vmem:[%s3041_s20 + $0x18] sm:$0xff]  ;;  %v1893_v12 = vld [vmem:[%s3041_s20 + $0x20] sm:$0xff]  ;;  %p2014_p11 = scmp.ge.s32.totalorder %s2013_s25, %s3798_s22  ;;  %p1878_p12 = scmp.ge.s32.totalorder %s1879_s24, %s3798_s22 }
 0x177   : >> { %1890 = vst [vmem:[%s3037_s15 + $0x10] sm:$0xff] %v1889_v10  ;;  %v1895_v13 = vld [vmem:[%s3041_s20 + $0x28] sm:$0xff]  ;;  %1892 = vst [vmem:[%s3037_s15 + $0x18] sm:$0xff] %v1891_v11  ;;  %v1897_v14 = vld [vmem:[%s3041_s20 + $0x30] sm:$0xff] }
 0x178   : >> { %1894 = vst [vmem:[%s3037_s15 + $0x20] sm:$0xff] %v1893_v12  ;;  %1896 = vst [vmem:[%s3037_s15 + $0x28] sm:$0xff] %v1895_v13  ;;  %v1899_v15 = vld [vmem:[%s3041_s20 + $0x38] sm:$0xff]  ;;  %v1901_v16 = vld [vmem:[%s3041_s20 + $0x40] sm:$0xff]  ;;  %s4007_s25 = smov (%p2014_p11, %s2013_s25), 0 }
 0x179   : >> { %1898 = vst [vmem:[%s3037_s15 + $0x30] sm:$0xff] %v1897_v14  ;;  %1900 = vst [vmem:[%s3037_s15 + $0x38] sm:$0xff] %v1899_v15  ;;  %v1903_v17 = vld [vmem:[%s3041_s20 + $0x48] sm:$0xff]  ;;  %v1905_v18 = vld [vmem:[%s3041_s20 + $0x50] sm:$0xff]  ;;  %s2291_s26 = sshll.u32 %s4007_s25, 9  ;;  %s4000_s23 = smov %s4007_s25 }
 0x17a   : >> { %1902 = vst [vmem:[%s3037_s15 + $0x40] sm:$0xff] %v1901_v16  ;;  %v1907_v19 = vld [vmem:[%s3041_s20 + $0x58] sm:$0xff]  ;;  %1904 = vst [vmem:[%s3037_s15 + $0x48] sm:$0xff] %v1903_v17  ;;  %v1909_v20 = vld [vmem:[%s3041_s20 + $0x60] sm:$0xff]  ;;  %s3865_s27 = scalar_lea.vmem %s3410_s8, %s2291_s26 [#allocation2]   ;;  %s3868_s28 = scalar_lea.vmem %s3792_s18, %s2291_s26  }
 0x17b   : >> { %1906 = vst [vmem:[%s3037_s15 + $0x50] sm:$0xff] %v1905_v18  ;;  %1908 = vst [vmem:[%s3037_s15 + $0x58] sm:$0xff] %v1907_v19  ;;  %v1911_v21 = vld [vmem:[%s3041_s20 + $0x68] sm:$0xff]  ;;  %v1913_v22 = vld [vmem:[%s3041_s20 + $0x70] sm:$0xff] }
 0x17c   : >> { %1910 = vst [vmem:[%s3037_s15 + $0x60] sm:$0xff] %v1909_v20  ;;  %1912 = vst [vmem:[%s3037_s15 + $0x68] sm:$0xff] %v1911_v21  ;;  %v1915_v23 = vld [vmem:[%s3041_s20 + $0x78] sm:$0xff]  ;;  %v1917_v24 = vld [vmem:[%s3041_s20 + $0x80] sm:$0xff] }
 0x17d   : >> { %1914 = vst [vmem:[%s3037_s15 + $0x70] sm:$0xff] %v1913_v22  ;;  %v1919_v25 = vld [vmem:[%s3041_s20 + $0x88] sm:$0xff]  ;;  %1916 = vst [vmem:[%s3037_s15 + $0x78] sm:$0xff] %v1915_v23  ;;  %v1921_v26 = vld [vmem:[%s3041_s20 + $0x90] sm:$0xff] }
 0x17e   : >> { %1918 = vst [vmem:[%s3037_s15 + $0x80] sm:$0xff] %v1917_v24  ;;  %1920 = vst [vmem:[%s3037_s15 + $0x88] sm:$0xff] %v1919_v25  ;;  %v1923_v27 = vld [vmem:[%s3041_s20 + $0x98] sm:$0xff]  ;;  %v1925_v28 = vld [vmem:[%s3041_s20 + $0xa0] sm:$0xff] }
 0x17f   : >> { %1922 = vst [vmem:[%s3037_s15 + $0x90] sm:$0xff] %v1921_v26  ;;  %1924 = vst [vmem:[%s3037_s15 + $0x98] sm:$0xff] %v1923_v27  ;;  %v1927_v29 = vld [vmem:[%s3041_s20 + $0xa8] sm:$0xff]  ;;  %v1929_v30 = vld [vmem:[%s3041_s20 + $0xb0] sm:$0xff] }
 0x180   : >> { %1926 = vst [vmem:[%s3037_s15 + $0xa0] sm:$0xff] %v1925_v28  ;;  %v1931_v31 = vld [vmem:[%s3041_s20 + $0xb8] sm:$0xff]  ;;  %1928 = vst [vmem:[%s3037_s15 + $0xa8] sm:$0xff] %v1927_v29  ;;  %v1933_v32 = vld [vmem:[%s3041_s20 + $0xc0] sm:$0xff] }
 0x181   : >> { %1930 = vst [vmem:[%s3037_s15 + $0xb0] sm:$0xff] %v1929_v30  ;;  %1932 = vst [vmem:[%s3037_s15 + $0xb8] sm:$0xff] %v1931_v31  ;;  %v1935_v33 = vld [vmem:[%s3041_s20 + $0xc8] sm:$0xff]  ;;  %v1937_v34 = vld [vmem:[%s3041_s20 + $0xd0] sm:$0xff] }
 0x182   : >> { %1934 = vst [vmem:[%s3037_s15 + $0xc0] sm:$0xff] %v1933_v32  ;;  %1936 = vst [vmem:[%s3037_s15 + $0xc8] sm:$0xff] %v1935_v33  ;;  %v1939_v35 = vld [vmem:[%s3041_s20 + $0xd8] sm:$0xff]  ;;  %v1941_v36 = vld [vmem:[%s3041_s20 + $0xe0] sm:$0xff] }
 0x183   : >> { %1938 = vst [vmem:[%s3037_s15 + $0xd0] sm:$0xff] %v1937_v34  ;;  %v1943_v37 = vld [vmem:[%s3041_s20 + $0xe8] sm:$0xff]  ;;  %1940 = vst [vmem:[%s3037_s15 + $0xd8] sm:$0xff] %v1939_v35  ;;  %v1945_v38 = vld [vmem:[%s3041_s20 + $0xf0] sm:$0xff] }
 0x184   : >> { %1942 = vst [vmem:[%s3037_s15 + $0xe0] sm:$0xff] %v1941_v36  ;;  %1944 = vst [vmem:[%s3037_s15 + $0xe8] sm:$0xff] %v1943_v37  ;;  %v1947_v39 = vld [vmem:[%s3041_s20 + $0xf8] sm:$0xff]  ;;  %v1949_v40 = vld [vmem:[%s3041_s20 + $0x100] sm:$0xff] }
 0x185   : >> { %1946 = vst [vmem:[%s3037_s15 + $0xf0] sm:$0xff] %v1945_v38  ;;  %1948 = vst [vmem:[%s3037_s15 + $0xf8] sm:$0xff] %v1947_v39  ;;  %v1951_v41 = vld [vmem:[%s3041_s20 + $0x108] sm:$0xff]  ;;  %v1953_v42 = vld [vmem:[%s3041_s20 + $0x110] sm:$0xff] }
 0x186   : >> { %1950 = vst [vmem:[%s3037_s15 + $0x100] sm:$0xff] %v1949_v40  ;;  %v1955_v43 = vld [vmem:[%s3041_s20 + $0x118] sm:$0xff]  ;;  %1952 = vst [vmem:[%s3037_s15 + $0x108] sm:$0xff] %v1951_v41  ;;  %v1957_v44 = vld [vmem:[%s3041_s20 + $0x120] sm:$0xff] }
 0x187   : >> { %1954 = vst [vmem:[%s3037_s15 + $0x110] sm:$0xff] %v1953_v42  ;;  %1956 = vst [vmem:[%s3037_s15 + $0x118] sm:$0xff] %v1955_v43  ;;  %v1959_v45 = vld [vmem:[%s3041_s20 + $0x128] sm:$0xff]  ;;  %v1961_v46 = vld [vmem:[%s3041_s20 + $0x130] sm:$0xff] }
 0x188   : >> { %1958 = vst [vmem:[%s3037_s15 + $0x120] sm:$0xff] %v1957_v44  ;;  %1960 = vst [vmem:[%s3037_s15 + $0x128] sm:$0xff] %v1959_v45  ;;  %v1963_v47 = vld [vmem:[%s3041_s20 + $0x138] sm:$0xff]  ;;  %v1965_v48 = vld [vmem:[%s3041_s20 + $0x140] sm:$0xff] }
 0x189   : >> { %1962 = vst [vmem:[%s3037_s15 + $0x130] sm:$0xff] %v1961_v46  ;;  %v1967_v49 = vld [vmem:[%s3041_s20 + $0x148] sm:$0xff]  ;;  %1964 = vst [vmem:[%s3037_s15 + $0x138] sm:$0xff] %v1963_v47  ;;  %v1969_v50 = vld [vmem:[%s3041_s20 + $0x150] sm:$0xff] }
 0x18a   : >> { %1966 = vst [vmem:[%s3037_s15 + $0x140] sm:$0xff] %v1965_v48  ;;  %1968 = vst [vmem:[%s3037_s15 + $0x148] sm:$0xff] %v1967_v49  ;;  %v1971_v51 = vld [vmem:[%s3041_s20 + $0x158] sm:$0xff]  ;;  %v1973_v52 = vld [vmem:[%s3041_s20 + $0x160] sm:$0xff] }
 0x18b   : >> { %1970 = vst [vmem:[%s3037_s15 + $0x150] sm:$0xff] %v1969_v50  ;;  %1972 = vst [vmem:[%s3037_s15 + $0x158] sm:$0xff] %v1971_v51  ;;  %v1975_v53 = vld [vmem:[%s3041_s20 + $0x168] sm:$0xff]  ;;  %v1977_v54 = vld [vmem:[%s3041_s20 + $0x170] sm:$0xff] }
 0x18c   : >> { %1974 = vst [vmem:[%s3037_s15 + $0x160] sm:$0xff] %v1973_v52  ;;  %v1979_v55 = vld [vmem:[%s3041_s20 + $0x178] sm:$0xff]  ;;  %1976 = vst [vmem:[%s3037_s15 + $0x168] sm:$0xff] %v1975_v53  ;;  %v1981_v56 = vld [vmem:[%s3041_s20 + $0x180] sm:$0xff] }
 0x18d   : >> { %1978 = vst [vmem:[%s3037_s15 + $0x170] sm:$0xff] %v1977_v54  ;;  %1980 = vst [vmem:[%s3037_s15 + $0x178] sm:$0xff] %v1979_v55  ;;  %v1983_v57 = vld [vmem:[%s3041_s20 + $0x188] sm:$0xff]  ;;  %v1985_v58 = vld [vmem:[%s3041_s20 + $0x190] sm:$0xff] }
 0x18e   : >> { %1982 = vst [vmem:[%s3037_s15 + $0x180] sm:$0xff] %v1981_v56  ;;  %1984 = vst [vmem:[%s3037_s15 + $0x188] sm:$0xff] %v1983_v57  ;;  %v1987_v59 = vld [vmem:[%s3041_s20 + $0x198] sm:$0xff]  ;;  %v1989_v60 = vld [vmem:[%s3041_s20 + $0x1a0] sm:$0xff] }
 0x18f   : >> { %1986 = vst [vmem:[%s3037_s15 + $0x190] sm:$0xff] %v1985_v58  ;;  %v1991_v61 = vld [vmem:[%s3041_s20 + $0x1a8] sm:$0xff]  ;;  %1988 = vst [vmem:[%s3037_s15 + $0x198] sm:$0xff] %v1987_v59  ;;  %v1993_v62 = vld [vmem:[%s3041_s20 + $0x1b0] sm:$0xff] }
 0x190   : >> { %1990 = vst [vmem:[%s3037_s15 + $0x1a0] sm:$0xff] %v1989_v60  ;;  %1992 = vst [vmem:[%s3037_s15 + $0x1a8] sm:$0xff] %v1991_v61  ;;  %v1995_v63 = vld [vmem:[%s3041_s20 + $0x1b8] sm:$0xff]  ;;  %v1997_v0 = vld [vmem:[%s3041_s20 + $0x1c0] sm:$0xff] }
 0x191   : >> { %1994 = vst [vmem:[%s3037_s15 + $0x1b0] sm:$0xff] %v1993_v62  ;;  %1996 = vst [vmem:[%s3037_s15 + $0x1b8] sm:$0xff] %v1995_v63  ;;  %v1999_v2 = vld [vmem:[%s3041_s20 + $0x1c8] sm:$0xff]  ;;  %v2001_v1 = vld [vmem:[%s3041_s20 + $0x1d0] sm:$0xff]  ;;  %1881 = sbr.rel (!%p1878_p12) target bundleno = 373 (0x175), region = 122 }
 0x192   : >> { %1998 = vst [vmem:[%s3037_s15 + $0x1c0] sm:$0xff] %v1997_v0  ;;  %v2003_v3 = vld [vmem:[%s3041_s20 + $0x1d8] sm:$0xff]  ;;  %2000 = vst [vmem:[%s3037_s15 + $0x1c8] sm:$0xff] %v1999_v2  ;;  %v2005_v4 = vld [vmem:[%s3041_s20 + $0x1e0] sm:$0xff] }
 0x193   : >> { %2002 = vst [vmem:[%s3037_s15 + $0x1d0] sm:$0xff] %v2001_v1  ;;  %2004 = vst [vmem:[%s3037_s15 + $0x1d8] sm:$0xff] %v2003_v3  ;;  %v2007_v5 = vld [vmem:[%s3041_s20 + $0x1e8] sm:$0xff]  ;;  %v2009_v6 = vld [vmem:[%s3041_s20 + $0x1f0] sm:$0xff] }
 0x194   : >> { %2006 = vst [vmem:[%s3037_s15 + $0x1e0] sm:$0xff] %v2005_v4  ;;  %2008 = vst [vmem:[%s3037_s15 + $0x1e8] sm:$0xff] %v2007_v5  ;;  %v2011_v7 = vld [vmem:[%s3041_s20 + $0x1f8] sm:$0xff]  ;;  %s3999_s20 = smov %s3865_s27 }
 0x195   : >> { %2010 = vst [vmem:[%s3037_s15 + $0x1f0] sm:$0xff] %v2009_v6  ;;  %2012 = vst [vmem:[%s3037_s15 + $0x1f8] sm:$0xff] %v2011_v7  ;;  %s3998_s15 = smov %s3868_s28 }
 0x196 PF: > { %s3973_s29 = sand.u32 63, %s4005_s11   ;;  %s2302_s30 = sshll.u32 %s3798_s22, 9 }
 0x197   : > { %s2024_s4 = scalar_lea.vmem %s3410_s8, %s2302_s30 [#allocation2]   ;;  %s2026_s5 = scalar_lea.vmem %s3792_s18, %s2302_s30  }
 0x198   : > { %p2296_p13 = scmp.le.s32.totalorder %s3973_s29, 0 }
 0x199   : > { %s3051_s6 = smov (!%p2296_p13), %s2026_s5   ;;  %s3055_s7 = smov (!%p2296_p13), %s2024_s4  }
 0x19a   : > { %2117 = sbr.rel (%p2296_p13) target bundleno = 423 (0x1a7), region = 127  ;;  %s3059_s9 = smov (!%p2296_p13), 0  }
 0x19b   : > { %s3063_s10 = smov (!%p2296_p13), 0  }
 0x19f LB: >> { %v2036_v8 = vld [vmem:[%s3057_s7] sm:$0xff]  ;;  %s2038_s11 = sadd.s32 1, %s3061_s9  ;;  %s2030_s10 = sadd.s32 1, %s3065_s10   ;;  %s3065_s10 = sphi %s3063_s10, %s2030_s10   ;;  %s3061_s9 = sphi %s3059_s9, %s3060_s9   ;;  %s3057_s7 = sphi %s3055_s7, %s2043_s7   ;;  %s3053_s6 = sphi %s3051_s6, %s2044_s6  }
 0x1a0   : >> { %2037 = vst [vmem:[%s3053_s6] sm:$0xff] %v2036_v8  ;;  %p2039_p0 = scmp.ge.s32.totalorder %s2038_s11, %s3973_s29  ;;  %p2029_p1 = scmp.ge.s32.totalorder %s2030_s10, %s3973_s29 }
 0x1a2   : >> { %s4009_s11 = smov (%p2039_p0, %s2038_s11), 0  ;;  %2032 = sbr.rel (!%p2029_p1) target bundleno = 415 (0x19f), region = 133 }
 0x1a3   : >> { %s2297_s8 = sshll.u32 %s4009_s11, 3  ;;  %s3060_s9 = smov %s4009_s11  }
 0x1a4   : >> { %s2043_s7 = scalar_lea.vmem %s2024_s4, %s2297_s8 [#allocation2]   ;;  %s2044_s6 = scalar_lea.vmem %s2026_s5, %s2297_s8  }
 0x1a7 PF: > { %p10_p2 = scmp.ge.s32.totalorder %s3102_s16, 4   ;;  %s4001_s12 = smov %s3029_s13 }
 0x1a8   : > { %s4002_s13 = smov %s3110_s19  ;;  %s4003_s14 = smov %s3102_s16 }
 0x1a9   :  { %12 = sbr.rel (!%p10_p2) target bundleno = 2 (0x2), region = 144 }

</bundles_post_ra>
